<compile_context>
chip_gen: v7x
topology: tpu7x:2x2x1
jax: 0.10.0
libtpu: 0.0.40
codegen_flags: <defaults>
</compile_context>

<pallas_src>
import math

import jax
import jax.numpy as jnp
from jax.experimental import pallas as pl
from jax.experimental.pallas import tpu as pltpu


def _make_spp3d_kernel(geoms, H, mode):
    """geoms: per level (kd, kw, kh, sd, sw, sh, od, ow, oh).  H = input height
    (needed because W and H are merged on the lane axis: lane = w*H + h)."""
    is_max = mode == "max"
    combine = jnp.maximum if is_max else jnp.add

    def red_sublane(a):  # reduce axis 0 (sublanes), keepdims
        return (jnp.max if is_max else jnp.sum)(a, axis=0, keepdims=True)

    def red_lane(a):     # reduce axis 1 (lanes), keepdims
        return (jnp.max if is_max else jnp.sum)(a, axis=1, keepdims=True)

    def kernel(x_ref, *o_refs):
        # x_ref : (1, C, D, W*H) block for the current batch element.
        # o_refs: one (1, C, od, ow*oh) block per pyramid level.
        C = x_ref.shape[1]
        for c in range(C):
            # One channel slab, f32 compute (bf16-safe on v5e, stable avg).
            xc = x_ref[0, c, :, :].astype(jnp.float32)      # (D, W*H)
            for o_ref, (kd, kw, kh, sd, sw, sh, od, ow, oh) in zip(o_refs, geoms):
                # ---- pool over D (sublane axis) -> (od, W*H) -------------
                d_parts = [red_sublane(xc[i * sd:i * sd + kd, :])
                           for i in range(od)]
                xd = d_parts[0] if od == 1 else jnp.concatenate(d_parts, axis=0)
                # ---- pool over (W, H): lane index = w*H + h --------------
                # Combine the kw lane-slices elementwise, then one lane reduce
                # over the kh-wide window (separable: kw + 1 ops, not kw*kh).
                pieces = []
                for j in range(ow):
                    for l in range(oh):
                        acc = None
                        for w in range(j * sw, j * sw + kw):
                            lo = w * H + l * sh
                            sl = xd[:, lo:lo + kh]           # (od, kh)
                            acc = sl if acc is None else combine(acc, sl)
                        pieces.append(red_lane(acc))         # (od, 1)
                y = pieces[0] if len(pieces) == 1 else jnp.concatenate(pieces, axis=1)
                if not is_max:
                    y = y * (1.0 / float(kd * kw * kh))      # mean = sum * const
                # Single store per (channel, level): (od, ow*oh) slab, ordered
                # (i, j*oh + l) -> matches torch's row-major flatten exactly.
                o_ref[0, c, :, :] = y.astype(o_ref.dtype)

    return kernel


def spp3d_pallas(x, levels, mode="max"):
    """x: [N, C, D, W, H] (same layout as the PyTorch module's forward)."""
    if mode not in ("max", "avg"):
        raise RuntimeError('Unknown pooling type: %s, please use "max" or "avg".' % mode)

    N, C, D, W, H = x.shape

    geoms = []
    for n in levels:
        kd, kw, kh = (math.ceil(s / n) for s in (D, W, H))
        sd, sw, sh = (math.floor(s / n) for s in (D, W, H))
        if min(sd, sw, sh) < 1:
            raise ValueError(
                "Spp3D level %d is larger than spatial dims %s (stride would be 0)."
                % (n, (D, W, H)))
        od = (D - kd) // sd + 1
        ow = (W - kw) // sw + 1
        oh = (H - kh) // sh + 1
        geoms.append((kd, kw, kh, sd, sw, sh, od, ow, oh))

    # Free, contiguous reshape (NOT a transpose): merge W,H onto the lane axis.
    x_flat = x.reshape(N, C, D, W * H)

    kern = _make_spp3d_kernel(geoms, H, mode)

    out_shape = tuple(
        jax.ShapeDtypeStruct((N, C, od, ow * oh), x.dtype)
        for (_, _, _, _, _, _, od, ow, oh) in geoms)
    out_specs = tuple(
        pl.BlockSpec((1, C, od, ow * oh), lambda b: (b, 0, 0, 0))
        for (_, _, _, _, _, _, od, ow, oh) in geoms)

    ys = pl.pallas_call(
        kern,
        grid=(N,),
        in_specs=[pl.BlockSpec((1, C, D, W * H), lambda b: (b, 0, 0, 0))],
        out_specs=out_specs,
        out_shape=out_shape,
        compiler_params=pltpu.CompilerParams(
            dimension_semantics=("parallel",)),
    )(x_flat)

    # (N, C, od, ow*oh) -> (N, C*od*ow*oh) is a free row-major reshape that
    # matches torch's y.view(N, -1); concat across levels matches torch.cat.
    return jnp.concatenate([y.reshape(N, -1) for y in ys], axis=1)


def spp3d_ref(x, levels, mode="max"):
    """Pure-JAX reference (lax.reduce_window) for validation."""
    N, C, D, W, H = x.shape
    outs = []
    for n in levels:
        kd, kw, kh = (math.ceil(s / n) for s in (D, W, H))
        sd, sw, sh = (math.floor(s / n) for s in (D, W, H))
        if mode == "max":
            y = jax.lax.reduce_window(
                x, -jnp.inf, jax.lax.max,
                window_dimensions=(1, 1, kd, kw, kh),
                window_strides=(1, 1, sd, sw, sh),
                padding="VALID")
        else:
            y = jax.lax.reduce_window(
                x, 0.0, jax.lax.add,
                window_dimensions=(1, 1, kd, kw, kh),
                window_strides=(1, 1, sd, sw, sh),
                padding="VALID") / float(kd * kw * kh)
        outs.append(y.reshape(N, -1))
    return jnp.concatenate(outs, axis=1)


if __name__ == "__main__":
    # Spp3D has no learnable parameters; only the pooling levels / mode.
    levels = (1, 2, 4)

    key = jax.random.PRNGKey(0)
    # x: [batch=2, channel=4, depth=8, width=8, height=8]  (NCDWH, as torch)
    x = jax.random.normal(key, (2, 4, 8, 8, 8), dtype=jnp.float32)

    out_max = jax.block_until_ready(spp3d_pallas(x, levels, mode="max"))
    ref_max = jax.block_until_ready(spp3d_ref(x, levels, mode="max"))
    assert out_max.shape == (2, 4 * (1 + 8 + 64)), out_max.shape
    assert jnp.allclose(out_max, ref_max, atol=1e-6, rtol=1e-6), "max mismatch vs reference"

    out_avg = jax.block_until_ready(spp3d_pallas(x, levels, mode="avg"))
    ref_avg = jax.block_until_ready(spp3d_ref(x, levels, mode="avg"))
    assert jnp.allclose(out_avg, ref_avg, atol=1e-5, rtol=1e-5), "avg mismatch vs reference"

    print("KERNEL_OK")
</pallas_src>

<mosaic_0001>
module attributes {stable_mosaic.version = 11 : i64} {
  func.func @kernel(%arg0: i32, %arg1: memref<1x4x8x64xf32, #tpu.memory_space<vmem>>, %arg2: memref<1x4x1x1xf32, #tpu.memory_space<vmem>>, %arg3: memref<1x4x2x4xf32, #tpu.memory_space<vmem>>, %arg4: memref<1x4x4x16xf32, #tpu.memory_space<vmem>>) attributes {dimension_semantics = [#tpu.dimension_semantics<parallel>], iteration_bounds = array<i64: 2>, scalar_prefetch = 0 : i64, scratch_operands = 0 : i64, tpu.core_type = #tpu.core_type<tc>, window_params = [{transform_indices = @transform_0, window_bounds = array<i64: 1, 4, 8, 64>}, {transform_indices = @transform_1, window_bounds = array<i64: 1, 4, 1, 1>}, {transform_indices = @transform_2, window_bounds = array<i64: 1, 4, 2, 4>}, {transform_indices = @transform_3, window_bounds = array<i64: 1, 4, 4, 16>}]} {
    %c0 = arith.constant 0 : index
    %c0_0 = arith.constant 0 : index
    %c0_1 = arith.constant 0 : index
    %c0_2 = arith.constant 0 : index
    %0 = vector.load %arg1[%c0, %c0_0, %c0_1, %c0_2] : memref<1x4x8x64xf32, #tpu.memory_space<vmem>>, vector<1x1x8x64xf32>
    %1 = vector.shape_cast %0 : vector<1x1x8x64xf32> to vector<8x64xf32>
    %cst = arith.constant dense<0xFF800000> : vector<64xf32>
    %2 = vector.multi_reduction <maximumf>, %1, %cst [0] : vector<8x64xf32> to vector<64xf32>
    %3 = vector.shape_cast %2 : vector<64xf32> to vector<1x64xf32>
    %4 = vector.extract_strided_slice %3 {offsets = [0, 0], sizes = [1, 8], strides = [1, 1]} : vector<1x64xf32> to vector<1x8xf32>
    %5 = vector.extract_strided_slice %3 {offsets = [0, 8], sizes = [1, 8], strides = [1, 1]} : vector<1x64xf32> to vector<1x8xf32>
    %6 = arith.maximumf %4, %5 : vector<1x8xf32>
    %7 = vector.extract_strided_slice %3 {offsets = [0, 16], sizes = [1, 8], strides = [1, 1]} : vector<1x64xf32> to vector<1x8xf32>
    %8 = arith.maximumf %6, %7 : vector<1x8xf32>
    %9 = vector.extract_strided_slice %3 {offsets = [0, 24], sizes = [1, 8], strides = [1, 1]} : vector<1x64xf32> to vector<1x8xf32>
    %10 = arith.maximumf %8, %9 : vector<1x8xf32>
    %11 = vector.extract_strided_slice %3 {offsets = [0, 32], sizes = [1, 8], strides = [1, 1]} : vector<1x64xf32> to vector<1x8xf32>
    %12 = arith.maximumf %10, %11 : vector<1x8xf32>
    %13 = vector.extract_strided_slice %3 {offsets = [0, 40], sizes = [1, 8], strides = [1, 1]} : vector<1x64xf32> to vector<1x8xf32>
    %14 = arith.maximumf %12, %13 : vector<1x8xf32>
    %15 = vector.extract_strided_slice %3 {offsets = [0, 48], sizes = [1, 8], strides = [1, 1]} : vector<1x64xf32> to vector<1x8xf32>
    %16 = arith.maximumf %14, %15 : vector<1x8xf32>
    %17 = vector.extract_strided_slice %3 {offsets = [0, 56], sizes = [1, 8], strides = [1, 1]} : vector<1x64xf32> to vector<1x8xf32>
    %18 = arith.maximumf %16, %17 : vector<1x8xf32>
    %cst_3 = arith.constant dense<0xFF800000> : vector<1xf32>
    %19 = vector.multi_reduction <maximumf>, %18, %cst_3 [1] : vector<1x8xf32> to vector<1xf32>
    %20 = vector.shape_cast %19 : vector<1xf32> to vector<1x1xf32>
    %c0_4 = arith.constant 0 : index
    %c0_5 = arith.constant 0 : index
    %c0_6 = arith.constant 0 : index
    %c0_7 = arith.constant 0 : index
    %21 = vector.load %arg2[%c0_4, %c0_5, %c0_6, %c0_7] : memref<1x4x1x1xf32, #tpu.memory_space<vmem>>, vector<1x1x1x1xf32>
    %22 = vector.shape_cast %21 : vector<1x1x1x1xf32> to vector<1x1xf32>
    %23 = vector.shape_cast %20 : vector<1x1xf32> to vector<1x1x1x1xf32>
    tpu.vector_store %arg2[%c0_4, %c0_5, %c0_6, %c0_7], %23 {strides = array<i32>} : memref<1x4x1x1xf32, #tpu.memory_space<vmem>>, vector<1x1x1x1xf32>,
    %24 = vector.extract_strided_slice %1 {offsets = [0, 0], sizes = [4, 64], strides = [1, 1]} : vector<8x64xf32> to vector<4x64xf32>
    %cst_8 = arith.constant dense<0xFF800000> : vector<64xf32>
    %25 = vector.multi_reduction <maximumf>, %24, %cst_8 [0] : vector<4x64xf32> to vector<64xf32>
    %26 = vector.shape_cast %25 : vector<64xf32> to vector<1x64xf32>
    %27 = vector.extract_strided_slice %1 {offsets = [4, 0], sizes = [4, 64], strides = [1, 1]} : vector<8x64xf32> to vector<4x64xf32>
    %cst_9 = arith.constant dense<0xFF800000> : vector<64xf32>
    %28 = vector.multi_reduction <maximumf>, %27, %cst_9 [0] : vector<4x64xf32> to vector<64xf32>
    %29 = vector.shape_cast %28 : vector<64xf32> to vector<1x64xf32>
    %30 = tpu.concatenate %26, %29 in 0 : vector<1x64xf32>, vector<1x64xf32> -> vector<2x64xf32>
    %31 = vector.extract_strided_slice %30 {offsets = [0, 0], sizes = [2, 4], strides = [1, 1]} : vector<2x64xf32> to vector<2x4xf32>
    %32 = vector.extract_strided_slice %30 {offsets = [0, 8], sizes = [2, 4], strides = [1, 1]} : vector<2x64xf32> to vector<2x4xf32>
    %33 = arith.maximumf %31, %32 : vector<2x4xf32>
    %34 = vector.extract_strided_slice %30 {offsets = [0, 16], sizes = [2, 4], strides = [1, 1]} : vector<2x64xf32> to vector<2x4xf32>
    %35 = arith.maximumf %33, %34 : vector<2x4xf32>
    %36 = vector.extract_strided_slice %30 {offsets = [0, 24], sizes = [2, 4], strides = [1, 1]} : vector<2x64xf32> to vector<2x4xf32>
    %37 = arith.maximumf %35, %36 : vector<2x4xf32>
    %cst_10 = arith.constant dense<0xFF800000> : vector<2xf32>
    %38 = vector.multi_reduction <maximumf>, %37, %cst_10 [1] : vector<2x4xf32> to vector<2xf32>
    %39 = vector.shape_cast %38 : vector<2xf32> to vector<2x1xf32>
    %40 = vector.extract_strided_slice %30 {offsets = [0, 4], sizes = [2, 4], strides = [1, 1]} : vector<2x64xf32> to vector<2x4xf32>
    %41 = vector.extract_strided_slice %30 {offsets = [0, 12], sizes = [2, 4], strides = [1, 1]} : vector<2x64xf32> to vector<2x4xf32>
    %42 = arith.maximumf %40, %41 : vector<2x4xf32>
    %43 = vector.extract_strided_slice %30 {offsets = [0, 20], sizes = [2, 4], strides = [1, 1]} : vector<2x64xf32> to vector<2x4xf32>
    %44 = arith.maximumf %42, %43 : vector<2x4xf32>
    %45 = vector.extract_strided_slice %30 {offsets = [0, 28], sizes = [2, 4], strides = [1, 1]} : vector<2x64xf32> to vector<2x4xf32>
    %46 = arith.maximumf %44, %45 : vector<2x4xf32>
    %cst_11 = arith.constant dense<0xFF800000> : vector<2xf32>
    %47 = vector.multi_reduction <maximumf>, %46, %cst_11 [1] : vector<2x4xf32> to vector<2xf32>
    %48 = vector.shape_cast %47 : vector<2xf32> to vector<2x1xf32>
    %49 = vector.extract_strided_slice %30 {offsets = [0, 32], sizes = [2, 4], strides = [1, 1]} : vector<2x64xf32> to vector<2x4xf32>
    %50 = vector.extract_strided_slice %30 {offsets = [0, 40], sizes = [2, 4], strides = [1, 1]} : vector<2x64xf32> to vector<2x4xf32>
    %51 = arith.maximumf %49, %50 : vector<2x4xf32>
    %52 = vector.extract_strided_slice %30 {offsets = [0, 48], sizes = [2, 4], strides = [1, 1]} : vector<2x64xf32> to vector<2x4xf32>
    %53 = arith.maximumf %51, %52 : vector<2x4xf32>
    %54 = vector.extract_strided_slice %30 {offsets = [0, 56], sizes = [2, 4], strides = [1, 1]} : vector<2x64xf32> to vector<2x4xf32>
    %55 = arith.maximumf %53, %54 : vector<2x4xf32>
    %cst_12 = arith.constant dense<0xFF800000> : vector<2xf32>
    %56 = vector.multi_reduction <maximumf>, %55, %cst_12 [1] : vector<2x4xf32> to vector<2xf32>
    %57 = vector.shape_cast %56 : vector<2xf32> to vector<2x1xf32>
    %58 = vector.extract_strided_slice %30 {offsets = [0, 36], sizes = [2, 4], strides = [1, 1]} : vector<2x64xf32> to vector<2x4xf32>
    %59 = vector.extract_strided_slice %30 {offsets = [0, 44], sizes = [2, 4], strides = [1, 1]} : vector<2x64xf32> to vector<2x4xf32>
    %60 = arith.maximumf %58, %59 : vector<2x4xf32>
    %61 = vector.extract_strided_slice %30 {offsets = [0, 52], sizes = [2, 4], strides = [1, 1]} : vector<2x64xf32> to vector<2x4xf32>
    %62 = arith.maximumf %60, %61 : vector<2x4xf32>
    %63 = vector.extract_strided_slice %30 {offsets = [0, 60], sizes = [2, 4], strides = [1, 1]} : vector<2x64xf32> to vector<2x4xf32>
    %64 = arith.maximumf %62, %63 : vector<2x4xf32>
    %cst_13 = arith.constant dense<0xFF800000> : vector<2xf32>
    %65 = vector.multi_reduction <maximumf>, %64, %cst_13 [1] : vector<2x4xf32> to vector<2xf32>
    %66 = vector.shape_cast %65 : vector<2xf32> to vector<2x1xf32>
    %67 = tpu.concatenate %39, %48, %57, %66 in 1 : vector<2x1xf32>, vector<2x1xf32>, vector<2x1xf32>, vector<2x1xf32> -> vector<2x4xf32>
    %c0_14 = arith.constant 0 : index
    %c0_15 = arith.constant 0 : index
    %c0_16 = arith.constant 0 : index
    %c0_17 = arith.constant 0 : index
    %68 = vector.load %arg3[%c0_14, %c0_15, %c0_16, %c0_17] : memref<1x4x2x4xf32, #tpu.memory_space<vmem>>, vector<1x1x2x4xf32>
    %69 = vector.shape_cast %68 : vector<1x1x2x4xf32> to vector<2x4xf32>
    %70 = vector.shape_cast %67 : vector<2x4xf32> to vector<1x1x2x4xf32>
    tpu.vector_store %arg3[%c0_14, %c0_15, %c0_16, %c0_17], %70 {strides = array<i32>} : memref<1x4x2x4xf32, #tpu.memory_space<vmem>>, vector<1x1x2x4xf32>,
    %71 = vector.extract_strided_slice %1 {offsets = [0, 0], sizes = [2, 64], strides = [1, 1]} : vector<8x64xf32> to vector<2x64xf32>
    %cst_18 = arith.constant dense<0xFF800000> : vector<64xf32>
    %72 = vector.multi_reduction <maximumf>, %71, %cst_18 [0] : vector<2x64xf32> to vector<64xf32>
    %73 = vector.shape_cast %72 : vector<64xf32> to vector<1x64xf32>
    %74 = vector.extract_strided_slice %1 {offsets = [2, 0], sizes = [2, 64], strides = [1, 1]} : vector<8x64xf32> to vector<2x64xf32>
    %cst_19 = arith.constant dense<0xFF800000> : vector<64xf32>
    %75 = vector.multi_reduction <maximumf>, %74, %cst_19 [0] : vector<2x64xf32> to vector<64xf32>
    %76 = vector.shape_cast %75 : vector<64xf32> to vector<1x64xf32>
    %77 = vector.extract_strided_slice %1 {offsets = [4, 0], sizes = [2, 64], strides = [1, 1]} : vector<8x64xf32> to vector<2x64xf32>
    %cst_20 = arith.constant dense<0xFF800000> : vector<64xf32>
    %78 = vector.multi_reduction <maximumf>, %77, %cst_20 [0] : vector<2x64xf32> to vector<64xf32>
    %79 = vector.shape_cast %78 : vector<64xf32> to vector<1x64xf32>
    %80 = vector.extract_strided_slice %1 {offsets = [6, 0], sizes = [2, 64], strides = [1, 1]} : vector<8x64xf32> to vector<2x64xf32>
    %cst_21 = arith.constant dense<0xFF800000> : vector<64xf32>
    %81 = vector.multi_reduction <maximumf>, %80, %cst_21 [0] : vector<2x64xf32> to vector<64xf32>
    %82 = vector.shape_cast %81 : vector<64xf32> to vector<1x64xf32>
    %83 = tpu.concatenate %73, %76, %79, %82 in 0 : vector<1x64xf32>, vector<1x64xf32>, vector<1x64xf32>, vector<1x64xf32> -> vector<4x64xf32>
    %84 = vector.extract_strided_slice %83 {offsets = [0, 0], sizes = [4, 2], strides = [1, 1]} : vector<4x64xf32> to vector<4x2xf32>
    %85 = vector.extract_strided_slice %83 {offsets = [0, 8], sizes = [4, 2], strides = [1, 1]} : vector<4x64xf32> to vector<4x2xf32>
    %86 = arith.maximumf %84, %85 : vector<4x2xf32>
    %cst_22 = arith.constant dense<0xFF800000> : vector<4xf32>
    %87 = vector.multi_reduction <maximumf>, %86, %cst_22 [1] : vector<4x2xf32> to vector<4xf32>
    %88 = vector.shape_cast %87 : vector<4xf32> to vector<4x1xf32>
    %89 = vector.extract_strided_slice %83 {offsets = [0, 2], sizes = [4, 2], strides = [1, 1]} : vector<4x64xf32> to vector<4x2xf32>
    %90 = vector.extract_strided_slice %83 {offsets = [0, 10], sizes = [4, 2], strides = [1, 1]} : vector<4x64xf32> to vector<4x2xf32>
    %91 = arith.maximumf %89, %90 : vector<4x2xf32>
    %cst_23 = arith.constant dense<0xFF800000> : vector<4xf32>
    %92 = vector.multi_reduction <maximumf>, %91, %cst_23 [1] : vector<4x2xf32> to vector<4xf32>
    %93 = vector.shape_cast %92 : vector<4xf32> to vector<4x1xf32>
    %94 = vector.extract_strided_slice %83 {offsets = [0, 4], sizes = [4, 2], strides = [1, 1]} : vector<4x64xf32> to vector<4x2xf32>
    %95 = vector.extract_strided_slice %83 {offsets = [0, 12], sizes = [4, 2], strides = [1, 1]} : vector<4x64xf32> to vector<4x2xf32>
    %96 = arith.maximumf %94, %95 : vector<4x2xf32>
    %cst_24 = arith.constant dense<0xFF800000> : vector<4xf32>
    %97 = vector.multi_reduction <maximumf>, %96, %cst_24 [1] : vector<4x2xf32> to vector<4xf32>
    %98 = vector.shape_cast %97 : vector<4xf32> to vector<4x1xf32>
    %99 = vector.extract_strided_slice %83 {offsets = [0, 6], sizes = [4, 2], strides = [1, 1]} : vector<4x64xf32> to vector<4x2xf32>
    %100 = vector.extract_strided_slice %83 {offsets = [0, 14], sizes = [4, 2], strides = [1, 1]} : vector<4x64xf32> to vector<4x2xf32>
    %101 = arith.maximumf %99, %100 : vector<4x2xf32>
    %cst_25 = arith.constant dense<0xFF800000> : vector<4xf32>
    %102 = vector.multi_reduction <maximumf>, %101, %cst_25 [1] : vector<4x2xf32> to vector<4xf32>
    %103 = vector.shape_cast %102 : vector<4xf32> to vector<4x1xf32>
    %104 = vector.extract_strided_slice %83 {offsets = [0, 16], sizes = [4, 2], strides = [1, 1]} : vector<4x64xf32> to vector<4x2xf32>
    %105 = vector.extract_strided_slice %83 {offsets = [0, 24], sizes = [4, 2], strides = [1, 1]} : vector<4x64xf32> to vector<4x2xf32>
    %106 = arith.maximumf %104, %105 : vector<4x2xf32>
    %cst_26 = arith.constant dense<0xFF800000> : vector<4xf32>
    %107 = vector.multi_reduction <maximumf>, %106, %cst_26 [1] : vector<4x2xf32> to vector<4xf32>
    %108 = vector.shape_cast %107 : vector<4xf32> to vector<4x1xf32>
    %109 = vector.extract_strided_slice %83 {offsets = [0, 18], sizes = [4, 2], strides = [1, 1]} : vector<4x64xf32> to vector<4x2xf32>
    %110 = vector.extract_strided_slice %83 {offsets = [0, 26], sizes = [4, 2], strides = [1, 1]} : vector<4x64xf32> to vector<4x2xf32>
    %111 = arith.maximumf %109, %110 : vector<4x2xf32>
    %cst_27 = arith.constant dense<0xFF800000> : vector<4xf32>
    %112 = vector.multi_reduction <maximumf>, %111, %cst_27 [1] : vector<4x2xf32> to vector<4xf32>
    %113 = vector.shape_cast %112 : vector<4xf32> to vector<4x1xf32>
    %114 = vector.extract_strided_slice %83 {offsets = [0, 20], sizes = [4, 2], strides = [1, 1]} : vector<4x64xf32> to vector<4x2xf32>
    %115 = vector.extract_strided_slice %83 {offsets = [0, 28], sizes = [4, 2], strides = [1, 1]} : vector<4x64xf32> to vector<4x2xf32>
    %116 = arith.maximumf %114, %115 : vector<4x2xf32>
    %cst_28 = arith.constant dense<0xFF800000> : vector<4xf32>
    %117 = vector.multi_reduction <maximumf>, %116, %cst_28 [1] : vector<4x2xf32> to vector<4xf32>
    %118 = vector.shape_cast %117 : vector<4xf32> to vector<4x1xf32>
    %119 = vector.extract_strided_slice %83 {offsets = [0, 22], sizes = [4, 2], strides = [1, 1]} : vector<4x64xf32> to vector<4x2xf32>
    %120 = vector.extract_strided_slice %83 {offsets = [0, 30], sizes = [4, 2], strides = [1, 1]} : vector<4x64xf32> to vector<4x2xf32>
    %121 = arith.maximumf %119, %120 : vector<4x2xf32>
    %cst_29 = arith.constant dense<0xFF800000> : vector<4xf32>
    %122 = vector.multi_reduction <maximumf>, %121, %cst_29 [1] : vector<4x2xf32> to vector<4xf32>
    %123 = vector.shape_cast %122 : vector<4xf32> to vector<4x1xf32>
    %124 = vector.extract_strided_slice %83 {offsets = [0, 32], sizes = [4, 2], strides = [1, 1]} : vector<4x64xf32> to vector<4x2xf32>
    %125 = vector.extract_strided_slice %83 {offsets = [0, 40], sizes = [4, 2], strides = [1, 1]} : vector<4x64xf32> to vector<4x2xf32>
    %126 = arith.maximumf %124, %125 : vector<4x2xf32>
    %cst_30 = arith.constant dense<0xFF800000> : vector<4xf32>
    %127 = vector.multi_reduction <maximumf>, %126, %cst_30 [1] : vector<4x2xf32> to vector<4xf32>
    %128 = vector.shape_cast %127 : vector<4xf32> to vector<4x1xf32>
    %129 = vector.extract_strided_slice %83 {offsets = [0, 34], sizes = [4, 2], strides = [1, 1]} : vector<4x64xf32> to vector<4x2xf32>
    %130 = vector.extract_strided_slice %83 {offsets = [0, 42], sizes = [4, 2], strides = [1, 1]} : vector<4x64xf32> to vector<4x2xf32>
    %131 = arith.maximumf %129, %130 : vector<4x2xf32>
    %cst_31 = arith.constant dense<0xFF800000> : vector<4xf32>
    %132 = vector.multi_reduction <maximumf>, %131, %cst_31 [1] : vector<4x2xf32> to vector<4xf32>
    %133 = vector.shape_cast %132 : vector<4xf32> to vector<4x1xf32>
    %134 = vector.extract_strided_slice %83 {offsets = [0, 36], sizes = [4, 2], strides = [1, 1]} : vector<4x64xf32> to vector<4x2xf32>
    %135 = vector.extract_strided_slice %83 {offsets = [0, 44], sizes = [4, 2], strides = [1, 1]} : vector<4x64xf32> to vector<4x2xf32>
    %136 = arith.maximumf %134, %135 : vector<4x2xf32>
    %cst_32 = arith.constant dense<0xFF800000> : vector<4xf32>
    %137 = vector.multi_reduction <maximumf>, %136, %cst_32 [1] : vector<4x2xf32> to vector<4xf32>
    %138 = vector.shape_cast %137 : vector<4xf32> to vector<4x1xf32>
    %139 = vector.extract_strided_slice %83 {offsets = [0, 38], sizes = [4, 2], strides = [1, 1]} : vector<4x64xf32> to vector<4x2xf32>
    %140 = vector.extract_strided_slice %83 {offsets = [0, 46], sizes = [4, 2], strides = [1, 1]} : vector<4x64xf32> to vector<4x2xf32>
    %141 = arith.maximumf %139, %140 : vector<4x2xf32>
    %cst_33 = arith.constant dense<0xFF800000> : vector<4xf32>
    %142 = vector.multi_reduction <maximumf>, %141, %cst_33 [1] : vector<4x2xf32> to vector<4xf32>
    %143 = vector.shape_cast %142 : vector<4xf32> to vector<4x1xf32>
    %144 = vector.extract_strided_slice %83 {offsets = [0, 48], sizes = [4, 2], strides = [1, 1]} : vector<4x64xf32> to vector<4x2xf32>
    %145 = vector.extract_strided_slice %83 {offsets = [0, 56], sizes = [4, 2], strides = [1, 1]} : vector<4x64xf32> to vector<4x2xf32>
    %146 = arith.maximumf %144, %145 : vector<4x2xf32>
    %cst_34 = arith.constant dense<0xFF800000> : vector<4xf32>
    %147 = vector.multi_reduction <maximumf>, %146, %cst_34 [1] : vector<4x2xf32> to vector<4xf32>
    %148 = vector.shape_cast %147 : vector<4xf32> to vector<4x1xf32>
    %149 = vector.extract_strided_slice %83 {offsets = [0, 50], sizes = [4, 2], strides = [1, 1]} : vector<4x64xf32> to vector<4x2xf32>
    %150 = vector.extract_strided_slice %83 {offsets = [0, 58], sizes = [4, 2], strides = [1, 1]} : vector<4x64xf32> to vector<4x2xf32>
    %151 = arith.maximumf %149, %150 : vector<4x2xf32>
    %cst_35 = arith.constant dense<0xFF800000> : vector<4xf32>
    %152 = vector.multi_reduction <maximumf>, %151, %cst_35 [1] : vector<4x2xf32> to vector<4xf32>
    %153 = vector.shape_cast %152 : vector<4xf32> to vector<4x1xf32>
    %154 = vector.extract_strided_slice %83 {offsets = [0, 52], sizes = [4, 2], strides = [1, 1]} : vector<4x64xf32> to vector<4x2xf32>
    %155 = vector.extract_strided_slice %83 {offsets = [0, 60], sizes = [4, 2], strides = [1, 1]} : vector<4x64xf32> to vector<4x2xf32>
    %156 = arith.maximumf %154, %155 : vector<4x2xf32>
    %cst_36 = arith.constant dense<0xFF800000> : vector<4xf32>
    %157 = vector.multi_reduction <maximumf>, %156, %cst_36 [1] : vector<4x2xf32> to vector<4xf32>
    %158 = vector.shape_cast %157 : vector<4xf32> to vector<4x1xf32>
    %159 = vector.extract_strided_slice %83 {offsets = [0, 54], sizes = [4, 2], strides = [1, 1]} : vector<4x64xf32> to vector<4x2xf32>
    %160 = vector.extract_strided_slice %83 {offsets = [0, 62], sizes = [4, 2], strides = [1, 1]} : vector<4x64xf32> to vector<4x2xf32>
    %161 = arith.maximumf %159, %160 : vector<4x2xf32>
    %cst_37 = arith.constant dense<0xFF800000> : vector<4xf32>
    %162 = vector.multi_reduction <maximumf>, %161, %cst_37 [1] : vector<4x2xf32> to vector<4xf32>
    %163 = vector.shape_cast %162 : vector<4xf32> to vector<4x1xf32>
    %164 = tpu.concatenate %88, %93, %98, %103, %108, %113, %118, %123, %128, %133, %138, %143, %148, %153, %158, %163 in 1 : vector<4x1xf32>, vector<4x1xf32>, vector<4x1xf32>, vector<4x1xf32>, vector<4x1xf32>, vector<4x1xf32>, vector<4x1xf32>, vector<4x1xf32>, vector<4x1xf32>, vector<4x1xf32>, vector<4x1xf32>, vector<4x1xf32>, vector<4x1xf32>, vector<4x1xf32>, vector<4x1xf32>, vector<4x1xf32> -> vector<4x16xf32>
    %c0_38 = arith.constant 0 : index
    %c0_39 = arith.constant 0 : index
    %c0_40 = arith.constant 0 : index
    %c0_41 = arith.constant 0 : index
    %165 = vector.load %arg4[%c0_38, %c0_39, %c0_40, %c0_41] : memref<1x4x4x16xf32, #tpu.memory_space<vmem>>, vector<1x1x4x16xf32>
    %166 = vector.shape_cast %165 : vector<1x1x4x16xf32> to vector<4x16xf32>
    %167 = vector.shape_cast %164 : vector<4x16xf32> to vector<1x1x4x16xf32>
    tpu.vector_store %arg4[%c0_38, %c0_39, %c0_40, %c0_41], %167 {strides = array<i32>} : memref<1x4x4x16xf32, #tpu.memory_space<vmem>>, vector<1x1x4x16xf32>,
    %c0_42 = arith.constant 0 : index
    %c1 = arith.constant 1 : index
    %c0_43 = arith.constant 0 : index
    %c0_44 = arith.constant 0 : index
    %168 = vector.load %arg1[%c0_42, %c1, %c0_43, %c0_44] : memref<1x4x8x64xf32, #tpu.memory_space<vmem>>, vector<1x1x8x64xf32>
    %169 = vector.shape_cast %168 : vector<1x1x8x64xf32> to vector<8x64xf32>
    %cst_45 = arith.constant dense<0xFF800000> : vector<64xf32>
    %170 = vector.multi_reduction <maximumf>, %169, %cst_45 [0] : vector<8x64xf32> to vector<64xf32>
    %171 = vector.shape_cast %170 : vector<64xf32> to vector<1x64xf32>
    %172 = vector.extract_strided_slice %171 {offsets = [0, 0], sizes = [1, 8], strides = [1, 1]} : vector<1x64xf32> to vector<1x8xf32>
    %173 = vector.extract_strided_slice %171 {offsets = [0, 8], sizes = [1, 8], strides = [1, 1]} : vector<1x64xf32> to vector<1x8xf32>
    %174 = arith.maximumf %172, %173 : vector<1x8xf32>
    %175 = vector.extract_strided_slice %171 {offsets = [0, 16], sizes = [1, 8], strides = [1, 1]} : vector<1x64xf32> to vector<1x8xf32>
    %176 = arith.maximumf %174, %175 : vector<1x8xf32>
    %177 = vector.extract_strided_slice %171 {offsets = [0, 24], sizes = [1, 8], strides = [1, 1]} : vector<1x64xf32> to vector<1x8xf32>
    %178 = arith.maximumf %176, %177 : vector<1x8xf32>
    %179 = vector.extract_strided_slice %171 {offsets = [0, 32], sizes = [1, 8], strides = [1, 1]} : vector<1x64xf32> to vector<1x8xf32>
    %180 = arith.maximumf %178, %179 : vector<1x8xf32>
    %181 = vector.extract_strided_slice %171 {offsets = [0, 40], sizes = [1, 8], strides = [1, 1]} : vector<1x64xf32> to vector<1x8xf32>
    %182 = arith.maximumf %180, %181 : vector<1x8xf32>
    %183 = vector.extract_strided_slice %171 {offsets = [0, 48], sizes = [1, 8], strides = [1, 1]} : vector<1x64xf32> to vector<1x8xf32>
    %184 = arith.maximumf %182, %183 : vector<1x8xf32>
    %185 = vector.extract_strided_slice %171 {offsets = [0, 56], sizes = [1, 8], strides = [1, 1]} : vector<1x64xf32> to vector<1x8xf32>
    %186 = arith.maximumf %184, %185 : vector<1x8xf32>
    %cst_46 = arith.constant dense<0xFF800000> : vector<1xf32>
    %187 = vector.multi_reduction <maximumf>, %186, %cst_46 [1] : vector<1x8xf32> to vector<1xf32>
    %188 = vector.shape_cast %187 : vector<1xf32> to vector<1x1xf32>
    %c0_47 = arith.constant 0 : index
    %c1_48 = arith.constant 1 : index
    %c0_49 = arith.constant 0 : index
    %c0_50 = arith.constant 0 : index
    %189 = vector.load %arg2[%c0_47, %c1_48, %c0_49, %c0_50] : memref<1x4x1x1xf32, #tpu.memory_space<vmem>>, vector<1x1x1x1xf32>
    %190 = vector.shape_cast %189 : vector<1x1x1x1xf32> to vector<1x1xf32>
    %191 = vector.shape_cast %188 : vector<1x1xf32> to vector<1x1x1x1xf32>
    tpu.vector_store %arg2[%c0_47, %c1_48, %c0_49, %c0_50], %191 {strides = array<i32>} : memref<1x4x1x1xf32, #tpu.memory_space<vmem>>, vector<1x1x1x1xf32>,
    %192 = vector.extract_strided_slice %169 {offsets = [0, 0], sizes = [4, 64], strides = [1, 1]} : vector<8x64xf32> to vector<4x64xf32>
    %cst_51 = arith.constant dense<0xFF800000> : vector<64xf32>
    %193 = vector.multi_reduction <maximumf>, %192, %cst_51 [0] : vector<4x64xf32> to vector<64xf32>
    %194 = vector.shape_cast %193 : vector<64xf32> to vector<1x64xf32>
    %195 = vector.extract_strided_slice %169 {offsets = [4, 0], sizes = [4, 64], strides = [1, 1]} : vector<8x64xf32> to vector<4x64xf32>
    %cst_52 = arith.constant dense<0xFF800000> : vector<64xf32>
    %196 = vector.multi_reduction <maximumf>, %195, %cst_52 [0] : vector<4x64xf32> to vector<64xf32>
    %197 = vector.shape_cast %196 : vector<64xf32> to vector<1x64xf32>
    %198 = tpu.concatenate %194, %197 in 0 : vector<1x64xf32>, vector<1x64xf32> -> vector<2x64xf32>
    %199 = vector.extract_strided_slice %198 {offsets = [0, 0], sizes = [2, 4], strides = [1, 1]} : vector<2x64xf32> to vector<2x4xf32>
    %200 = vector.extract_strided_slice %198 {offsets = [0, 8], sizes = [2, 4], strides = [1, 1]} : vector<2x64xf32> to vector<2x4xf32>
    %201 = arith.maximumf %199, %200 : vector<2x4xf32>
    %202 = vector.extract_strided_slice %198 {offsets = [0, 16], sizes = [2, 4], strides = [1, 1]} : vector<2x64xf32> to vector<2x4xf32>
    %203 = arith.maximumf %201, %202 : vector<2x4xf32>
    %204 = vector.extract_strided_slice %198 {offsets = [0, 24], sizes = [2, 4], strides = [1, 1]} : vector<2x64xf32> to vector<2x4xf32>
    %205 = arith.maximumf %203, %204 : vector<2x4xf32>
    %cst_53 = arith.constant dense<0xFF800000> : vector<2xf32>
    %206 = vector.multi_reduction <maximumf>, %205, %cst_53 [1] : vector<2x4xf32> to vector<2xf32>
    %207 = vector.shape_cast %206 : vector<2xf32> to vector<2x1xf32>
    %208 = vector.extract_strided_slice %198 {offsets = [0, 4], sizes = [2, 4], strides = [1, 1]} : vector<2x64xf32> to vector<2x4xf32>
    %209 = vector.extract_strided_slice %198 {offsets = [0, 12], sizes = [2, 4], strides = [1, 1]} : vector<2x64xf32> to vector<2x4xf32>
    %210 = arith.maximumf %208, %209 : vector<2x4xf32>
    %211 = vector.extract_strided_slice %198 {offsets = [0, 20], sizes = [2, 4], strides = [1, 1]} : vector<2x64xf32> to vector<2x4xf32>
    %212 = arith.maximumf %210, %211 : vector<2x4xf32>
    %213 = vector.extract_strided_slice %198 {offsets = [0, 28], sizes = [2, 4], strides = [1, 1]} : vector<2x64xf32> to vector<2x4xf32>
    %214 = arith.maximumf %212, %213 : vector<2x4xf32>
    %cst_54 = arith.constant dense<0xFF800000> : vector<2xf32>
    %215 = vector.multi_reduction <maximumf>, %214, %cst_54 [1] : vector<2x4xf32> to vector<2xf32>
    %216 = vector.shape_cast %215 : vector<2xf32> to vector<2x1xf32>
    %217 = vector.extract_strided_slice %198 {offsets = [0, 32], sizes = [2, 4], strides = [1, 1]} : vector<2x64xf32> to vector<2x4xf32>
    %218 = vector.extract_strided_slice %198 {offsets = [0, 40], sizes = [2, 4], strides = [1, 1]} : vector<2x64xf32> to vector<2x4xf32>
    %219 = arith.maximumf %217, %218 : vector<2x4xf32>
    %220 = vector.extract_strided_slice %198 {offsets = [0, 48], sizes = [2, 4], strides = [1, 1]} : vector<2x64xf32> to vector<2x4xf32>
    %221 = arith.maximumf %219, %220 : vector<2x4xf32>
    %222 = vector.extract_strided_slice %198 {offsets = [0, 56], sizes = [2, 4], strides = [1, 1]} : vector<2x64xf32> to vector<2x4xf32>
    %223 = arith.maximumf %221, %222 : vector<2x4xf32>
    %cst_55 = arith.constant dense<0xFF800000> : vector<2xf32>
    %224 = vector.multi_reduction <maximumf>, %223, %cst_55 [1] : vector<2x4xf32> to vector<2xf32>
    %225 = vector.shape_cast %224 : vector<2xf32> to vector<2x1xf32>
    %226 = vector.extract_strided_slice %198 {offsets = [0, 36], sizes = [2, 4], strides = [1, 1]} : vector<2x64xf32> to vector<2x4xf32>
    %227 = vector.extract_strided_slice %198 {offsets = [0, 44], sizes = [2, 4], strides = [1, 1]} : vector<2x64xf32> to vector<2x4xf32>
    %228 = arith.maximumf %226, %227 : vector<2x4xf32>
    %229 = vector.extract_strided_slice %198 {offsets = [0, 52], sizes = [2, 4], strides = [1, 1]} : vector<2x64xf32> to vector<2x4xf32>
    %230 = arith.maximumf %228, %229 : vector<2x4xf32>
    %231 = vector.extract_strided_slice %198 {offsets = [0, 60], sizes = [2, 4], strides = [1, 1]} : vector<2x64xf32> to vector<2x4xf32>
    %232 = arith.maximumf %230, %231 : vector<2x4xf32>
    %cst_56 = arith.constant dense<0xFF800000> : vector<2xf32>
    %233 = vector.multi_reduction <maximumf>, %232, %cst_56 [1] : vector<2x4xf32> to vector<2xf32>
    %234 = vector.shape_cast %233 : vector<2xf32> to vector<2x1xf32>
    %235 = tpu.concatenate %207, %216, %225, %234 in 1 : vector<2x1xf32>, vector<2x1xf32>, vector<2x1xf32>, vector<2x1xf32> -> vector<2x4xf32>
    %c0_57 = arith.constant 0 : index
    %c1_58 = arith.constant 1 : index
    %c0_59 = arith.constant 0 : index
    %c0_60 = arith.constant 0 : index
    %236 = vector.load %arg3[%c0_57, %c1_58, %c0_59, %c0_60] : memref<1x4x2x4xf32, #tpu.memory_space<vmem>>, vector<1x1x2x4xf32>
    %237 = vector.shape_cast %236 : vector<1x1x2x4xf32> to vector<2x4xf32>
    %238 = vector.shape_cast %235 : vector<2x4xf32> to vector<1x1x2x4xf32>
    tpu.vector_store %arg3[%c0_57, %c1_58, %c0_59, %c0_60], %238 {strides = array<i32>} : memref<1x4x2x4xf32, #tpu.memory_space<vmem>>, vector<1x1x2x4xf32>,
    %239 = vector.extract_strided_slice %169 {offsets = [0, 0], sizes = [2, 64], strides = [1, 1]} : vector<8x64xf32> to vector<2x64xf32>
    %cst_61 = arith.constant dense<0xFF800000> : vector<64xf32>
    %240 = vector.multi_reduction <maximumf>, %239, %cst_61 [0] : vector<2x64xf32> to vector<64xf32>
    %241 = vector.shape_cast %240 : vector<64xf32> to vector<1x64xf32>
    %242 = vector.extract_strided_slice %169 {offsets = [2, 0], sizes = [2, 64], strides = [1, 1]} : vector<8x64xf32> to vector<2x64xf32>
    %cst_62 = arith.constant dense<0xFF800000> : vector<64xf32>
    %243 = vector.multi_reduction <maximumf>, %242, %cst_62 [0] : vector<2x64xf32> to vector<64xf32>
    %244 = vector.shape_cast %243 : vector<64xf32> to vector<1x64xf32>
    %245 = vector.extract_strided_slice %169 {offsets = [4, 0], sizes = [2, 64], strides = [1, 1]} : vector<8x64xf32> to vector<2x64xf32>
    %cst_63 = arith.constant dense<0xFF800000> : vector<64xf32>
    %246 = vector.multi_reduction <maximumf>, %245, %cst_63 [0] : vector<2x64xf32> to vector<64xf32>
    %247 = vector.shape_cast %246 : vector<64xf32> to vector<1x64xf32>
    %248 = vector.extract_strided_slice %169 {offsets = [6, 0], sizes = [2, 64], strides = [1, 1]} : vector<8x64xf32> to vector<2x64xf32>
    %cst_64 = arith.constant dense<0xFF800000> : vector<64xf32>
    %249 = vector.multi_reduction <maximumf>, %248, %cst_64 [0] : vector<2x64xf32> to vector<64xf32>
    %250 = vector.shape_cast %249 : vector<64xf32> to vector<1x64xf32>
    %251 = tpu.concatenate %241, %244, %247, %250 in 0 : vector<1x64xf32>, vector<1x64xf32>, vector<1x64xf32>, vector<1x64xf32> -> vector<4x64xf32>
    %252 = vector.extract_strided_slice %251 {offsets = [0, 0], sizes = [4, 2], strides = [1, 1]} : vector<4x64xf32> to vector<4x2xf32>
    %253 = vector.extract_strided_slice %251 {offsets = [0, 8], sizes = [4, 2], strides = [1, 1]} : vector<4x64xf32> to vector<4x2xf32>
    %254 = arith.maximumf %252, %253 : vector<4x2xf32>
    %cst_65 = arith.constant dense<0xFF800000> : vector<4xf32>
    %255 = vector.multi_reduction <maximumf>, %254, %cst_65 [1] : vector<4x2xf32> to vector<4xf32>
    %256 = vector.shape_cast %255 : vector<4xf32> to vector<4x1xf32>
    %257 = vector.extract_strided_slice %251 {offsets = [0, 2], sizes = [4, 2], strides = [1, 1]} : vector<4x64xf32> to vector<4x2xf32>
    %258 = vector.extract_strided_slice %251 {offsets = [0, 10], sizes = [4, 2], strides = [1, 1]} : vector<4x64xf32> to vector<4x2xf32>
    %259 = arith.maximumf %257, %258 : vector<4x2xf32>
    %cst_66 = arith.constant dense<0xFF800000> : vector<4xf32>
    %260 = vector.multi_reduction <maximumf>, %259, %cst_66 [1] : vector<4x2xf32> to vector<4xf32>
    %261 = vector.shape_cast %260 : vector<4xf32> to vector<4x1xf32>
    %262 = vector.extract_strided_slice %251 {offsets = [0, 4], sizes = [4, 2], strides = [1, 1]} : vector<4x64xf32> to vector<4x2xf32>
    %263 = vector.extract_strided_slice %251 {offsets = [0, 12], sizes = [4, 2], strides = [1, 1]} : vector<4x64xf32> to vector<4x2xf32>
    %264 = arith.maximumf %262, %263 : vector<4x2xf32>
    %cst_67 = arith.constant dense<0xFF800000> : vector<4xf32>
    %265 = vector.multi_reduction <maximumf>, %264, %cst_67 [1] : vector<4x2xf32> to vector<4xf32>
    %266 = vector.shape_cast %265 : vector<4xf32> to vector<4x1xf32>
    %267 = vector.extract_strided_slice %251 {offsets = [0, 6], sizes = [4, 2], strides = [1, 1]} : vector<4x64xf32> to vector<4x2xf32>
    %268 = vector.extract_strided_slice %251 {offsets = [0, 14], sizes = [4, 2], strides = [1, 1]} : vector<4x64xf32> to vector<4x2xf32>
    %269 = arith.maximumf %267, %268 : vector<4x2xf32>
    %cst_68 = arith.constant dense<0xFF800000> : vector<4xf32>
    %270 = vector.multi_reduction <maximumf>, %269, %cst_68 [1] : vector<4x2xf32> to vector<4xf32>
    %271 = vector.shape_cast %270 : vector<4xf32> to vector<4x1xf32>
    %272 = vector.extract_strided_slice %251 {offsets = [0, 16], sizes = [4, 2], strides = [1, 1]} : vector<4x64xf32> to vector<4x2xf32>
    %273 = vector.extract_strided_slice %251 {offsets = [0, 24], sizes = [4, 2], strides = [1, 1]} : vector<4x64xf32> to vector<4x2xf32>
    %274 = arith.maximumf %272, %273 : vector<4x2xf32>
    %cst_69 = arith.constant dense<0xFF800000> : vector<4xf32>
    %275 = vector.multi_reduction <maximumf>, %274, %cst_69 [1] : vector<4x2xf32> to vector<4xf32>
    %276 = vector.shape_cast %275 : vector<4xf32> to vector<4x1xf32>
    %277 = vector.extract_strided_slice %251 {offsets = [0, 18], sizes = [4, 2], strides = [1, 1]} : vector<4x64xf32> to vector<4x2xf32>
    %278 = vector.extract_strided_slice %251 {offsets = [0, 26], sizes = [4, 2], strides = [1, 1]} : vector<4x64xf32> to vector<4x2xf32>
    %279 = arith.maximumf %277, %278 : vector<4x2xf32>
    %cst_70 = arith.constant dense<0xFF800000> : vector<4xf32>
    %280 = vector.multi_reduction <maximumf>, %279, %cst_70 [1] : vector<4x2xf32> to vector<4xf32>
    %281 = vector.shape_cast %280 : vector<4xf32> to vector<4x1xf32>
    %282 = vector.extract_strided_slice %251 {offsets = [0, 20], sizes = [4, 2], strides = [1, 1]} : vector<4x64xf32> to vector<4x2xf32>
    %283 = vector.extract_strided_slice %251 {offsets = [0, 28], sizes = [4, 2], strides = [1, 1]} : vector<4x64xf32> to vector<4x2xf32>
    %284 = arith.maximumf %282, %283 : vector<4x2xf32>
    %cst_71 = arith.constant dense<0xFF800000> : vector<4xf32>
    %285 = vector.multi_reduction <maximumf>, %284, %cst_71 [1] : vector<4x2xf32> to vector<4xf32>
    %286 = vector.shape_cast %285 : vector<4xf32> to vector<4x1xf32>
    %287 = vector.extract_strided_slice %251 {offsets = [0, 22], sizes = [4, 2], strides = [1, 1]} : vector<4x64xf32> to vector<4x2xf32>
    %288 = vector.extract_strided_slice %251 {offsets = [0, 30], sizes = [4, 2], strides = [1, 1]} : vector<4x64xf32> to vector<4x2xf32>
    %289 = arith.maximumf %287, %288 : vector<4x2xf32>
    %cst_72 = arith.constant dense<0xFF800000> : vector<4xf32>
    %290 = vector.multi_reduction <maximumf>, %289, %cst_72 [1] : vector<4x2xf32> to vector<4xf32>
    %291 = vector.shape_cast %290 : vector<4xf32> to vector<4x1xf32>
    %292 = vector.extract_strided_slice %251 {offsets = [0, 32], sizes = [4, 2], strides = [1, 1]} : vector<4x64xf32> to vector<4x2xf32>
    %293 = vector.extract_strided_slice %251 {offsets = [0, 40], sizes = [4, 2], strides = [1, 1]} : vector<4x64xf32> to vector<4x2xf32>
    %294 = arith.maximumf %292, %293 : vector<4x2xf32>
    %cst_73 = arith.constant dense<0xFF800000> : vector<4xf32>
    %295 = vector.multi_reduction <maximumf>, %294, %cst_73 [1] : vector<4x2xf32> to vector<4xf32>
    %296 = vector.shape_cast %295 : vector<4xf32> to vector<4x1xf32>
    %297 = vector.extract_strided_slice %251 {offsets = [0, 34], sizes = [4, 2], strides = [1, 1]} : vector<4x64xf32> to vector<4x2xf32>
    %298 = vector.extract_strided_slice %251 {offsets = [0, 42], sizes = [4, 2], strides = [1, 1]} : vector<4x64xf32> to vector<4x2xf32>
    %299 = arith.maximumf %297, %298 : vector<4x2xf32>
    %cst_74 = arith.constant dense<0xFF800000> : vector<4xf32>
    %300 = vector.multi_reduction <maximumf>, %299, %cst_74 [1] : vector<4x2xf32> to vector<4xf32>
    %301 = vector.shape_cast %300 : vector<4xf32> to vector<4x1xf32>
    %302 = vector.extract_strided_slice %251 {offsets = [0, 36], sizes = [4, 2], strides = [1, 1]} : vector<4x64xf32> to vector<4x2xf32>
    %303 = vector.extract_strided_slice %251 {offsets = [0, 44], sizes = [4, 2], strides = [1, 1]} : vector<4x64xf32> to vector<4x2xf32>
    %304 = arith.maximumf %302, %303 : vector<4x2xf32>
    %cst_75 = arith.constant dense<0xFF800000> : vector<4xf32>
    %305 = vector.multi_reduction <maximumf>, %304, %cst_75 [1] : vector<4x2xf32> to vector<4xf32>
    %306 = vector.shape_cast %305 : vector<4xf32> to vector<4x1xf32>
    %307 = vector.extract_strided_slice %251 {offsets = [0, 38], sizes = [4, 2], strides = [1, 1]} : vector<4x64xf32> to vector<4x2xf32>
    %308 = vector.extract_strided_slice %251 {offsets = [0, 46], sizes = [4, 2], strides = [1, 1]} : vector<4x64xf32> to vector<4x2xf32>
    %309 = arith.maximumf %307, %308 : vector<4x2xf32>
    %cst_76 = arith.constant dense<0xFF800000> : vector<4xf32>
    %310 = vector.multi_reduction <maximumf>, %309, %cst_76 [1] : vector<4x2xf32> to vector<4xf32>
    %311 = vector.shape_cast %310 : vector<4xf32> to vector<4x1xf32>
    %312 = vector.extract_strided_slice %251 {offsets = [0, 48], sizes = [4, 2], strides = [1, 1]} : vector<4x64xf32> to vector<4x2xf32>
    %313 = vector.extract_strided_slice %251 {offsets = [0, 56], sizes = [4, 2], strides = [1, 1]} : vector<4x64xf32> to vector<4x2xf32>
    %314 = arith.maximumf %312, %313 : vector<4x2xf32>
    %cst_77 = arith.constant dense<0xFF800000> : vector<4xf32>
    %315 = vector.multi_reduction <maximumf>, %314, %cst_77 [1] : vector<4x2xf32> to vector<4xf32>
    %316 = vector.shape_cast %315 : vector<4xf32> to vector<4x1xf32>
    %317 = vector.extract_strided_slice %251 {offsets = [0, 50], sizes = [4, 2], strides = [1, 1]} : vector<4x64xf32> to vector<4x2xf32>
    %318 = vector.extract_strided_slice %251 {offsets = [0, 58], sizes = [4, 2], strides = [1, 1]} : vector<4x64xf32> to vector<4x2xf32>
    %319 = arith.maximumf %317, %318 : vector<4x2xf32>
    %cst_78 = arith.constant dense<0xFF800000> : vector<4xf32>
    %320 = vector.multi_reduction <maximumf>, %319, %cst_78 [1] : vector<4x2xf32> to vector<4xf32>
    %321 = vector.shape_cast %320 : vector<4xf32> to vector<4x1xf32>
    %322 = vector.extract_strided_slice %251 {offsets = [0, 52], sizes = [4, 2], strides = [1, 1]} : vector<4x64xf32> to vector<4x2xf32>
    %323 = vector.extract_strided_slice %251 {offsets = [0, 60], sizes = [4, 2], strides = [1, 1]} : vector<4x64xf32> to vector<4x2xf32>
    %324 = arith.maximumf %322, %323 : vector<4x2xf32>
    %cst_79 = arith.constant dense<0xFF800000> : vector<4xf32>
    %325 = vector.multi_reduction <maximumf>, %324, %cst_79 [1] : vector<4x2xf32> to vector<4xf32>
    %326 = vector.shape_cast %325 : vector<4xf32> to vector<4x1xf32>
    %327 = vector.extract_strided_slice %251 {offsets = [0, 54], sizes = [4, 2], strides = [1, 1]} : vector<4x64xf32> to vector<4x2xf32>
    %328 = vector.extract_strided_slice %251 {offsets = [0, 62], sizes = [4, 2], strides = [1, 1]} : vector<4x64xf32> to vector<4x2xf32>
    %329 = arith.maximumf %327, %328 : vector<4x2xf32>
    %cst_80 = arith.constant dense<0xFF800000> : vector<4xf32>
    %330 = vector.multi_reduction <maximumf>, %329, %cst_80 [1] : vector<4x2xf32> to vector<4xf32>
    %331 = vector.shape_cast %330 : vector<4xf32> to vector<4x1xf32>
    %332 = tpu.concatenate %256, %261, %266, %271, %276, %281, %286, %291, %296, %301, %306, %311, %316, %321, %326, %331 in 1 : vector<4x1xf32>, vector<4x1xf32>, vector<4x1xf32>, vector<4x1xf32>, vector<4x1xf32>, vector<4x1xf32>, vector<4x1xf32>, vector<4x1xf32>, vector<4x1xf32>, vector<4x1xf32>, vector<4x1xf32>, vector<4x1xf32>, vector<4x1xf32>, vector<4x1xf32>, vector<4x1xf32>, vector<4x1xf32> -> vector<4x16xf32>
    %c0_81 = arith.constant 0 : index
    %c1_82 = arith.constant 1 : index
    %c0_83 = arith.constant 0 : index
    %c0_84 = arith.constant 0 : index
    %333 = vector.load %arg4[%c0_81, %c1_82, %c0_83, %c0_84] : memref<1x4x4x16xf32, #tpu.memory_space<vmem>>, vector<1x1x4x16xf32>
    %334 = vector.shape_cast %333 : vector<1x1x4x16xf32> to vector<4x16xf32>
    %335 = vector.shape_cast %332 : vector<4x16xf32> to vector<1x1x4x16xf32>
    tpu.vector_store %arg4[%c0_81, %c1_82, %c0_83, %c0_84], %335 {strides = array<i32>} : memref<1x4x4x16xf32, #tpu.memory_space<vmem>>, vector<1x1x4x16xf32>,
    %c0_85 = arith.constant 0 : index
    %c2 = arith.constant 2 : index
    %c0_86 = arith.constant 0 : index
    %c0_87 = arith.constant 0 : index
    %336 = vector.load %arg1[%c0_85, %c2, %c0_86, %c0_87] : memref<1x4x8x64xf32, #tpu.memory_space<vmem>>, vector<1x1x8x64xf32>
    %337 = vector.shape_cast %336 : vector<1x1x8x64xf32> to vector<8x64xf32>
    %cst_88 = arith.constant dense<0xFF800000> : vector<64xf32>
    %338 = vector.multi_reduction <maximumf>, %337, %cst_88 [0] : vector<8x64xf32> to vector<64xf32>
    %339 = vector.shape_cast %338 : vector<64xf32> to vector<1x64xf32>
    %340 = vector.extract_strided_slice %339 {offsets = [0, 0], sizes = [1, 8], strides = [1, 1]} : vector<1x64xf32> to vector<1x8xf32>
    %341 = vector.extract_strided_slice %339 {offsets = [0, 8], sizes = [1, 8], strides = [1, 1]} : vector<1x64xf32> to vector<1x8xf32>
    %342 = arith.maximumf %340, %341 : vector<1x8xf32>
    %343 = vector.extract_strided_slice %339 {offsets = [0, 16], sizes = [1, 8], strides = [1, 1]} : vector<1x64xf32> to vector<1x8xf32>
    %344 = arith.maximumf %342, %343 : vector<1x8xf32>
    %345 = vector.extract_strided_slice %339 {offsets = [0, 24], sizes = [1, 8], strides = [1, 1]} : vector<1x64xf32> to vector<1x8xf32>
    %346 = arith.maximumf %344, %345 : vector<1x8xf32>
    %347 = vector.extract_strided_slice %339 {offsets = [0, 32], sizes = [1, 8], strides = [1, 1]} : vector<1x64xf32> to vector<1x8xf32>
    %348 = arith.maximumf %346, %347 : vector<1x8xf32>
    %349 = vector.extract_strided_slice %339 {offsets = [0, 40], sizes = [1, 8], strides = [1, 1]} : vector<1x64xf32> to vector<1x8xf32>
    %350 = arith.maximumf %348, %349 : vector<1x8xf32>
    %351 = vector.extract_strided_slice %339 {offsets = [0, 48], sizes = [1, 8], strides = [1, 1]} : vector<1x64xf32> to vector<1x8xf32>
    %352 = arith.maximumf %350, %351 : vector<1x8xf32>
    %353 = vector.extract_strided_slice %339 {offsets = [0, 56], sizes = [1, 8], strides = [1, 1]} : vector<1x64xf32> to vector<1x8xf32>
    %354 = arith.maximumf %352, %353 : vector<1x8xf32>
    %cst_89 = arith.constant dense<0xFF800000> : vector<1xf32>
    %355 = vector.multi_reduction <maximumf>, %354, %cst_89 [1] : vector<1x8xf32> to vector<1xf32>
    %356 = vector.shape_cast %355 : vector<1xf32> to vector<1x1xf32>
    %c0_90 = arith.constant 0 : index
    %c2_91 = arith.constant 2 : index
    %c0_92 = arith.constant 0 : index
    %c0_93 = arith.constant 0 : index
    %357 = vector.load %arg2[%c0_90, %c2_91, %c0_92, %c0_93] : memref<1x4x1x1xf32, #tpu.memory_space<vmem>>, vector<1x1x1x1xf32>
    %358 = vector.shape_cast %357 : vector<1x1x1x1xf32> to vector<1x1xf32>
    %359 = vector.shape_cast %356 : vector<1x1xf32> to vector<1x1x1x1xf32>
    tpu.vector_store %arg2[%c0_90, %c2_91, %c0_92, %c0_93], %359 {strides = array<i32>} : memref<1x4x1x1xf32, #tpu.memory_space<vmem>>, vector<1x1x1x1xf32>,
    %360 = vector.extract_strided_slice %337 {offsets = [0, 0], sizes = [4, 64], strides = [1, 1]} : vector<8x64xf32> to vector<4x64xf32>
    %cst_94 = arith.constant dense<0xFF800000> : vector<64xf32>
    %361 = vector.multi_reduction <maximumf>, %360, %cst_94 [0] : vector<4x64xf32> to vector<64xf32>
    %362 = vector.shape_cast %361 : vector<64xf32> to vector<1x64xf32>
    %363 = vector.extract_strided_slice %337 {offsets = [4, 0], sizes = [4, 64], strides = [1, 1]} : vector<8x64xf32> to vector<4x64xf32>
    %cst_95 = arith.constant dense<0xFF800000> : vector<64xf32>
    %364 = vector.multi_reduction <maximumf>, %363, %cst_95 [0] : vector<4x64xf32> to vector<64xf32>
    %365 = vector.shape_cast %364 : vector<64xf32> to vector<1x64xf32>
    %366 = tpu.concatenate %362, %365 in 0 : vector<1x64xf32>, vector<1x64xf32> -> vector<2x64xf32>
    %367 = vector.extract_strided_slice %366 {offsets = [0, 0], sizes = [2, 4], strides = [1, 1]} : vector<2x64xf32> to vector<2x4xf32>
    %368 = vector.extract_strided_slice %366 {offsets = [0, 8], sizes = [2, 4], strides = [1, 1]} : vector<2x64xf32> to vector<2x4xf32>
    %369 = arith.maximumf %367, %368 : vector<2x4xf32>
    %370 = vector.extract_strided_slice %366 {offsets = [0, 16], sizes = [2, 4], strides = [1, 1]} : vector<2x64xf32> to vector<2x4xf32>
    %371 = arith.maximumf %369, %370 : vector<2x4xf32>
    %372 = vector.extract_strided_slice %366 {offsets = [0, 24], sizes = [2, 4], strides = [1, 1]} : vector<2x64xf32> to vector<2x4xf32>
    %373 = arith.maximumf %371, %372 : vector<2x4xf32>
    %cst_96 = arith.constant dense<0xFF800000> : vector<2xf32>
    %374 = vector.multi_reduction <maximumf>, %373, %cst_96 [1] : vector<2x4xf32> to vector<2xf32>
    %375 = vector.shape_cast %374 : vector<2xf32> to vector<2x1xf32>
    %376 = vector.extract_strided_slice %366 {offsets = [0, 4], sizes = [2, 4], strides = [1, 1]} : vector<2x64xf32> to vector<2x4xf32>
    %377 = vector.extract_strided_slice %366 {offsets = [0, 12], sizes = [2, 4], strides = [1, 1]} : vector<2x64xf32> to vector<2x4xf32>
    %378 = arith.maximumf %376, %377 : vector<2x4xf32>
    %379 = vector.extract_strided_slice %366 {offsets = [0, 20], sizes = [2, 4], strides = [1, 1]} : vector<2x64xf32> to vector<2x4xf32>
    %380 = arith.maximumf %378, %379 : vector<2x4xf32>
    %381 = vector.extract_strided_slice %366 {offsets = [0, 28], sizes = [2, 4], strides = [1, 1]} : vector<2x64xf32> to vector<2x4xf32>
    %382 = arith.maximumf %380, %381 : vector<2x4xf32>
    %cst_97 = arith.constant dense<0xFF800000> : vector<2xf32>
    %383 = vector.multi_reduction <maximumf>, %382, %cst_97 [1] : vector<2x4xf32> to vector<2xf32>
    %384 = vector.shape_cast %383 : vector<2xf32> to vector<2x1xf32>
    %385 = vector.extract_strided_slice %366 {offsets = [0, 32], sizes = [2, 4], strides = [1, 1]} : vector<2x64xf32> to vector<2x4xf32>
    %386 = vector.extract_strided_slice %366 {offsets = [0, 40], sizes = [2, 4], strides = [1, 1]} : vector<2x64xf32> to vector<2x4xf32>
    %387 = arith.maximumf %385, %386 : vector<2x4xf32>
    %388 = vector.extract_strided_slice %366 {offsets = [0, 48], sizes = [2, 4], strides = [1, 1]} : vector<2x64xf32> to vector<2x4xf32>
    %389 = arith.maximumf %387, %388 : vector<2x4xf32>
    %390 = vector.extract_strided_slice %366 {offsets = [0, 56], sizes = [2, 4], strides = [1, 1]} : vector<2x64xf32> to vector<2x4xf32>
    %391 = arith.maximumf %389, %390 : vector<2x4xf32>
    %cst_98 = arith.constant dense<0xFF800000> : vector<2xf32>
    %392 = vector.multi_reduction <maximumf>, %391, %cst_98 [1] : vector<2x4xf32> to vector<2xf32>
    %393 = vector.shape_cast %392 : vector<2xf32> to vector<2x1xf32>
    %394 = vector.extract_strided_slice %366 {offsets = [0, 36], sizes = [2, 4], strides = [1, 1]} : vector<2x64xf32> to vector<2x4xf32>
    %395 = vector.extract_strided_slice %366 {offsets = [0, 44], sizes = [2, 4], strides = [1, 1]} : vector<2x64xf32> to vector<2x4xf32>
    %396 = arith.maximumf %394, %395 : vector<2x4xf32>
    %397 = vector.extract_strided_slice %366 {offsets = [0, 52], sizes = [2, 4], strides = [1, 1]} : vector<2x64xf32> to vector<2x4xf32>
    %398 = arith.maximumf %396, %397 : vector<2x4xf32>
    %399 = vector.extract_strided_slice %366 {offsets = [0, 60], sizes = [2, 4], strides = [1, 1]} : vector<2x64xf32> to vector<2x4xf32>
    %400 = arith.maximumf %398, %399 : vector<2x4xf32>
    %cst_99 = arith.constant dense<0xFF800000> : vector<2xf32>
    %401 = vector.multi_reduction <maximumf>, %400, %cst_99 [1] : vector<2x4xf32> to vector<2xf32>
    %402 = vector.shape_cast %401 : vector<2xf32> to vector<2x1xf32>
    %403 = tpu.concatenate %375, %384, %393, %402 in 1 : vector<2x1xf32>, vector<2x1xf32>, vector<2x1xf32>, vector<2x1xf32> -> vector<2x4xf32>
    %c0_100 = arith.constant 0 : index
    %c2_101 = arith.constant 2 : index
    %c0_102 = arith.constant 0 : index
    %c0_103 = arith.constant 0 : index
    %404 = vector.load %arg3[%c0_100, %c2_101, %c0_102, %c0_103] : memref<1x4x2x4xf32, #tpu.memory_space<vmem>>, vector<1x1x2x4xf32>
    %405 = vector.shape_cast %404 : vector<1x1x2x4xf32> to vector<2x4xf32>
    %406 = vector.shape_cast %403 : vector<2x4xf32> to vector<1x1x2x4xf32>
    tpu.vector_store %arg3[%c0_100, %c2_101, %c0_102, %c0_103], %406 {strides = array<i32>} : memref<1x4x2x4xf32, #tpu.memory_space<vmem>>, vector<1x1x2x4xf32>,
    %407 = vector.extract_strided_slice %337 {offsets = [0, 0], sizes = [2, 64], strides = [1, 1]} : vector<8x64xf32> to vector<2x64xf32>
    %cst_104 = arith.constant dense<0xFF800000> : vector<64xf32>
    %408 = vector.multi_reduction <maximumf>, %407, %cst_104 [0] : vector<2x64xf32> to vector<64xf32>
    %409 = vector.shape_cast %408 : vector<64xf32> to vector<1x64xf32>
    %410 = vector.extract_strided_slice %337 {offsets = [2, 0], sizes = [2, 64], strides = [1, 1]} : vector<8x64xf32> to vector<2x64xf32>
    %cst_105 = arith.constant dense<0xFF800000> : vector<64xf32>
    %411 = vector.multi_reduction <maximumf>, %410, %cst_105 [0] : vector<2x64xf32> to vector<64xf32>
    %412 = vector.shape_cast %411 : vector<64xf32> to vector<1x64xf32>
    %413 = vector.extract_strided_slice %337 {offsets = [4, 0], sizes = [2, 64], strides = [1, 1]} : vector<8x64xf32> to vector<2x64xf32>
    %cst_106 = arith.constant dense<0xFF800000> : vector<64xf32>
    %414 = vector.multi_reduction <maximumf>, %413, %cst_106 [0] : vector<2x64xf32> to vector<64xf32>
    %415 = vector.shape_cast %414 : vector<64xf32> to vector<1x64xf32>
    %416 = vector.extract_strided_slice %337 {offsets = [6, 0], sizes = [2, 64], strides = [1, 1]} : vector<8x64xf32> to vector<2x64xf32>
    %cst_107 = arith.constant dense<0xFF800000> : vector<64xf32>
    %417 = vector.multi_reduction <maximumf>, %416, %cst_107 [0] : vector<2x64xf32> to vector<64xf32>
    %418 = vector.shape_cast %417 : vector<64xf32> to vector<1x64xf32>
    %419 = tpu.concatenate %409, %412, %415, %418 in 0 : vector<1x64xf32>, vector<1x64xf32>, vector<1x64xf32>, vector<1x64xf32> -> vector<4x64xf32>
    %420 = vector.extract_strided_slice %419 {offsets = [0, 0], sizes = [4, 2], strides = [1, 1]} : vector<4x64xf32> to vector<4x2xf32>
    %421 = vector.extract_strided_slice %419 {offsets = [0, 8], sizes = [4, 2], strides = [1, 1]} : vector<4x64xf32> to vector<4x2xf32>
    %422 = arith.maximumf %420, %421 : vector<4x2xf32>
    %cst_108 = arith.constant dense<0xFF800000> : vector<4xf32>
    %423 = vector.multi_reduction <maximumf>, %422, %cst_108 [1] : vector<4x2xf32> to vector<4xf32>
    %424 = vector.shape_cast %423 : vector<4xf32> to vector<4x1xf32>
    %425 = vector.extract_strided_slice %419 {offsets = [0, 2], sizes = [4, 2], strides = [1, 1]} : vector<4x64xf32> to vector<4x2xf32>
    %426 = vector.extract_strided_slice %419 {offsets = [0, 10], sizes = [4, 2], strides = [1, 1]} : vector<4x64xf32> to vector<4x2xf32>
    %427 = arith.maximumf %425, %426 : vector<4x2xf32>
    %cst_109 = arith.constant dense<0xFF800000> : vector<4xf32>
    %428 = vector.multi_reduction <maximumf>, %427, %cst_109 [1] : vector<4x2xf32> to vector<4xf32>
    %429 = vector.shape_cast %428 : vector<4xf32> to vector<4x1xf32>
    %430 = vector.extract_strided_slice %419 {offsets = [0, 4], sizes = [4, 2], strides = [1, 1]} : vector<4x64xf32> to vector<4x2xf32>
    %431 = vector.extract_strided_slice %419 {offsets = [0, 12], sizes = [4, 2], strides = [1, 1]} : vector<4x64xf32> to vector<4x2xf32>
    %432 = arith.maximumf %430, %431 : vector<4x2xf32>
    %cst_110 = arith.constant dense<0xFF800000> : vector<4xf32>
    %433 = vector.multi_reduction <maximumf>, %432, %cst_110 [1] : vector<4x2xf32> to vector<4xf32>
    %434 = vector.shape_cast %433 : vector<4xf32> to vector<4x1xf32>
    %435 = vector.extract_strided_slice %419 {offsets = [0, 6], sizes = [4, 2], strides = [1, 1]} : vector<4x64xf32> to vector<4x2xf32>
    %436 = vector.extract_strided_slice %419 {offsets = [0, 14], sizes = [4, 2], strides = [1, 1]} : vector<4x64xf32> to vector<4x2xf32>
    %437 = arith.maximumf %435, %436 : vector<4x2xf32>
    %cst_111 = arith.constant dense<0xFF800000> : vector<4xf32>
    %438 = vector.multi_reduction <maximumf>, %437, %cst_111 [1] : vector<4x2xf32> to vector<4xf32>
    %439 = vector.shape_cast %438 : vector<4xf32> to vector<4x1xf32>
    %440 = vector.extract_strided_slice %419 {offsets = [0, 16], sizes = [4, 2], strides = [1, 1]} : vector<4x64xf32> to vector<4x2xf32>
    %441 = vector.extract_strided_slice %419 {offsets = [0, 24], sizes = [4, 2], strides = [1, 1]} : vector<4x64xf32> to vector<4x2xf32>
    %442 = arith.maximumf %440, %441 : vector<4x2xf32>
    %cst_112 = arith.constant dense<0xFF800000> : vector<4xf32>
    %443 = vector.multi_reduction <maximumf>, %442, %cst_112 [1] : vector<4x2xf32> to vector<4xf32>
    %444 = vector.shape_cast %443 : vector<4xf32> to vector<4x1xf32>
    %445 = vector.extract_strided_slice %419 {offsets = [0, 18], sizes = [4, 2], strides = [1, 1]} : vector<4x64xf32> to vector<4x2xf32>
    %446 = vector.extract_strided_slice %419 {offsets = [0, 26], sizes = [4, 2], strides = [1, 1]} : vector<4x64xf32> to vector<4x2xf32>
    %447 = arith.maximumf %445, %446 : vector<4x2xf32>
    %cst_113 = arith.constant dense<0xFF800000> : vector<4xf32>
    %448 = vector.multi_reduction <maximumf>, %447, %cst_113 [1] : vector<4x2xf32> to vector<4xf32>
    %449 = vector.shape_cast %448 : vector<4xf32> to vector<4x1xf32>
    %450 = vector.extract_strided_slice %419 {offsets = [0, 20], sizes = [4, 2], strides = [1, 1]} : vector<4x64xf32> to vector<4x2xf32>
    %451 = vector.extract_strided_slice %419 {offsets = [0, 28], sizes = [4, 2], strides = [1, 1]} : vector<4x64xf32> to vector<4x2xf32>
    %452 = arith.maximumf %450, %451 : vector<4x2xf32>
    %cst_114 = arith.constant dense<0xFF800000> : vector<4xf32>
    %453 = vector.multi_reduction <maximumf>, %452, %cst_114 [1] : vector<4x2xf32> to vector<4xf32>
    %454 = vector.shape_cast %453 : vector<4xf32> to vector<4x1xf32>
    %455 = vector.extract_strided_slice %419 {offsets = [0, 22], sizes = [4, 2], strides = [1, 1]} : vector<4x64xf32> to vector<4x2xf32>
    %456 = vector.extract_strided_slice %419 {offsets = [0, 30], sizes = [4, 2], strides = [1, 1]} : vector<4x64xf32> to vector<4x2xf32>
    %457 = arith.maximumf %455, %456 : vector<4x2xf32>
    %cst_115 = arith.constant dense<0xFF800000> : vector<4xf32>
    %458 = vector.multi_reduction <maximumf>, %457, %cst_115 [1] : vector<4x2xf32> to vector<4xf32>
    %459 = vector.shape_cast %458 : vector<4xf32> to vector<4x1xf32>
    %460 = vector.extract_strided_slice %419 {offsets = [0, 32], sizes = [4, 2], strides = [1, 1]} : vector<4x64xf32> to vector<4x2xf32>
    %461 = vector.extract_strided_slice %419 {offsets = [0, 40], sizes = [4, 2], strides = [1, 1]} : vector<4x64xf32> to vector<4x2xf32>
    %462 = arith.maximumf %460, %461 : vector<4x2xf32>
    %cst_116 = arith.constant dense<0xFF800000> : vector<4xf32>
    %463 = vector.multi_reduction <maximumf>, %462, %cst_116 [1] : vector<4x2xf32> to vector<4xf32>
    %464 = vector.shape_cast %463 : vector<4xf32> to vector<4x1xf32>
    %465 = vector.extract_strided_slice %419 {offsets = [0, 34], sizes = [4, 2], strides = [1, 1]} : vector<4x64xf32> to vector<4x2xf32>
    %466 = vector.extract_strided_slice %419 {offsets = [0, 42], sizes = [4, 2], strides = [1, 1]} : vector<4x64xf32> to vector<4x2xf32>
    %467 = arith.maximumf %465, %466 : vector<4x2xf32>
    %cst_117 = arith.constant dense<0xFF800000> : vector<4xf32>
    %468 = vector.multi_reduction <maximumf>, %467, %cst_117 [1] : vector<4x2xf32> to vector<4xf32>
    %469 = vector.shape_cast %468 : vector<4xf32> to vector<4x1xf32>
    %470 = vector.extract_strided_slice %419 {offsets = [0, 36], sizes = [4, 2], strides = [1, 1]} : vector<4x64xf32> to vector<4x2xf32>
    %471 = vector.extract_strided_slice %419 {offsets = [0, 44], sizes = [4, 2], strides = [1, 1]} : vector<4x64xf32> to vector<4x2xf32>
    %472 = arith.maximumf %470, %471 : vector<4x2xf32>
    %cst_118 = arith.constant dense<0xFF800000> : vector<4xf32>
    %473 = vector.multi_reduction <maximumf>, %472, %cst_118 [1] : vector<4x2xf32> to vector<4xf32>
    %474 = vector.shape_cast %473 : vector<4xf32> to vector<4x1xf32>
    %475 = vector.extract_strided_slice %419 {offsets = [0, 38], sizes = [4, 2], strides = [1, 1]} : vector<4x64xf32> to vector<4x2xf32>
    %476 = vector.extract_strided_slice %419 {offsets = [0, 46], sizes = [4, 2], strides = [1, 1]} : vector<4x64xf32> to vector<4x2xf32>
    %477 = arith.maximumf %475, %476 : vector<4x2xf32>
    %cst_119 = arith.constant dense<0xFF800000> : vector<4xf32>
    %478 = vector.multi_reduction <maximumf>, %477, %cst_119 [1] : vector<4x2xf32> to vector<4xf32>
    %479 = vector.shape_cast %478 : vector<4xf32> to vector<4x1xf32>
    %480 = vector.extract_strided_slice %419 {offsets = [0, 48], sizes = [4, 2], strides = [1, 1]} : vector<4x64xf32> to vector<4x2xf32>
    %481 = vector.extract_strided_slice %419 {offsets = [0, 56], sizes = [4, 2], strides = [1, 1]} : vector<4x64xf32> to vector<4x2xf32>
    %482 = arith.maximumf %480, %481 : vector<4x2xf32>
    %cst_120 = arith.constant dense<0xFF800000> : vector<4xf32>
    %483 = vector.multi_reduction <maximumf>, %482, %cst_120 [1] : vector<4x2xf32> to vector<4xf32>
    %484 = vector.shape_cast %483 : vector<4xf32> to vector<4x1xf32>
    %485 = vector.extract_strided_slice %419 {offsets = [0, 50], sizes = [4, 2], strides = [1, 1]} : vector<4x64xf32> to vector<4x2xf32>
    %486 = vector.extract_strided_slice %419 {offsets = [0, 58], sizes = [4, 2], strides = [1, 1]} : vector<4x64xf32> to vector<4x2xf32>
    %487 = arith.maximumf %485, %486 : vector<4x2xf32>
    %cst_121 = arith.constant dense<0xFF800000> : vector<4xf32>
    %488 = vector.multi_reduction <maximumf>, %487, %cst_121 [1] : vector<4x2xf32> to vector<4xf32>
    %489 = vector.shape_cast %488 : vector<4xf32> to vector<4x1xf32>
    %490 = vector.extract_strided_slice %419 {offsets = [0, 52], sizes = [4, 2], strides = [1, 1]} : vector<4x64xf32> to vector<4x2xf32>
    %491 = vector.extract_strided_slice %419 {offsets = [0, 60], sizes = [4, 2], strides = [1, 1]} : vector<4x64xf32> to vector<4x2xf32>
    %492 = arith.maximumf %490, %491 : vector<4x2xf32>
    %cst_122 = arith.constant dense<0xFF800000> : vector<4xf32>
    %493 = vector.multi_reduction <maximumf>, %492, %cst_122 [1] : vector<4x2xf32> to vector<4xf32>
    %494 = vector.shape_cast %493 : vector<4xf32> to vector<4x1xf32>
    %495 = vector.extract_strided_slice %419 {offsets = [0, 54], sizes = [4, 2], strides = [1, 1]} : vector<4x64xf32> to vector<4x2xf32>
    %496 = vector.extract_strided_slice %419 {offsets = [0, 62], sizes = [4, 2], strides = [1, 1]} : vector<4x64xf32> to vector<4x2xf32>
    %497 = arith.maximumf %495, %496 : vector<4x2xf32>
    %cst_123 = arith.constant dense<0xFF800000> : vector<4xf32>
    %498 = vector.multi_reduction <maximumf>, %497, %cst_123 [1] : vector<4x2xf32> to vector<4xf32>
    %499 = vector.shape_cast %498 : vector<4xf32> to vector<4x1xf32>
    %500 = tpu.concatenate %424, %429, %434, %439, %444, %449, %454, %459, %464, %469, %474, %479, %484, %489, %494, %499 in 1 : vector<4x1xf32>, vector<4x1xf32>, vector<4x1xf32>, vector<4x1xf32>, vector<4x1xf32>, vector<4x1xf32>, vector<4x1xf32>, vector<4x1xf32>, vector<4x1xf32>, vector<4x1xf32>, vector<4x1xf32>, vector<4x1xf32>, vector<4x1xf32>, vector<4x1xf32>, vector<4x1xf32>, vector<4x1xf32> -> vector<4x16xf32>
    %c0_124 = arith.constant 0 : index
    %c2_125 = arith.constant 2 : index
    %c0_126 = arith.constant 0 : index
    %c0_127 = arith.constant 0 : index
    %501 = vector.load %arg4[%c0_124, %c2_125, %c0_126, %c0_127] : memref<1x4x4x16xf32, #tpu.memory_space<vmem>>, vector<1x1x4x16xf32>
    %502 = vector.shape_cast %501 : vector<1x1x4x16xf32> to vector<4x16xf32>
    %503 = vector.shape_cast %500 : vector<4x16xf32> to vector<1x1x4x16xf32>
    tpu.vector_store %arg4[%c0_124, %c2_125, %c0_126, %c0_127], %503 {strides = array<i32>} : memref<1x4x4x16xf32, #tpu.memory_space<vmem>>, vector<1x1x4x16xf32>,
    %c0_128 = arith.constant 0 : index
    %c3 = arith.constant 3 : index
    %c0_129 = arith.constant 0 : index
    %c0_130 = arith.constant 0 : index
    %504 = vector.load %arg1[%c0_128, %c3, %c0_129, %c0_130] : memref<1x4x8x64xf32, #tpu.memory_space<vmem>>, vector<1x1x8x64xf32>
    %505 = vector.shape_cast %504 : vector<1x1x8x64xf32> to vector<8x64xf32>
    %cst_131 = arith.constant dense<0xFF800000> : vector<64xf32>
    %506 = vector.multi_reduction <maximumf>, %505, %cst_131 [0] : vector<8x64xf32> to vector<64xf32>
    %507 = vector.shape_cast %506 : vector<64xf32> to vector<1x64xf32>
    %508 = vector.extract_strided_slice %507 {offsets = [0, 0], sizes = [1, 8], strides = [1, 1]} : vector<1x64xf32> to vector<1x8xf32>
    %509 = vector.extract_strided_slice %507 {offsets = [0, 8], sizes = [1, 8], strides = [1, 1]} : vector<1x64xf32> to vector<1x8xf32>
    %510 = arith.maximumf %508, %509 : vector<1x8xf32>
    %511 = vector.extract_strided_slice %507 {offsets = [0, 16], sizes = [1, 8], strides = [1, 1]} : vector<1x64xf32> to vector<1x8xf32>
    %512 = arith.maximumf %510, %511 : vector<1x8xf32>
    %513 = vector.extract_strided_slice %507 {offsets = [0, 24], sizes = [1, 8], strides = [1, 1]} : vector<1x64xf32> to vector<1x8xf32>
    %514 = arith.maximumf %512, %513 : vector<1x8xf32>
    %515 = vector.extract_strided_slice %507 {offsets = [0, 32], sizes = [1, 8], strides = [1, 1]} : vector<1x64xf32> to vector<1x8xf32>
    %516 = arith.maximumf %514, %515 : vector<1x8xf32>
    %517 = vector.extract_strided_slice %507 {offsets = [0, 40], sizes = [1, 8], strides = [1, 1]} : vector<1x64xf32> to vector<1x8xf32>
    %518 = arith.maximumf %516, %517 : vector<1x8xf32>
    %519 = vector.extract_strided_slice %507 {offsets = [0, 48], sizes = [1, 8], strides = [1, 1]} : vector<1x64xf32> to vector<1x8xf32>
    %520 = arith.maximumf %518, %519 : vector<1x8xf32>
    %521 = vector.extract_strided_slice %507 {offsets = [0, 56], sizes = [1, 8], strides = [1, 1]} : vector<1x64xf32> to vector<1x8xf32>
    %522 = arith.maximumf %520, %521 : vector<1x8xf32>
    %cst_132 = arith.constant dense<0xFF800000> : vector<1xf32>
    %523 = vector.multi_reduction <maximumf>, %522, %cst_132 [1] : vector<1x8xf32> to vector<1xf32>
    %524 = vector.shape_cast %523 : vector<1xf32> to vector<1x1xf32>
    %c0_133 = arith.constant 0 : index
    %c3_134 = arith.constant 3 : index
    %c0_135 = arith.constant 0 : index
    %c0_136 = arith.constant 0 : index
    %525 = vector.load %arg2[%c0_133, %c3_134, %c0_135, %c0_136] : memref<1x4x1x1xf32, #tpu.memory_space<vmem>>, vector<1x1x1x1xf32>
    %526 = vector.shape_cast %525 : vector<1x1x1x1xf32> to vector<1x1xf32>
    %527 = vector.shape_cast %524 : vector<1x1xf32> to vector<1x1x1x1xf32>
    tpu.vector_store %arg2[%c0_133, %c3_134, %c0_135, %c0_136], %527 {strides = array<i32>} : memref<1x4x1x1xf32, #tpu.memory_space<vmem>>, vector<1x1x1x1xf32>,
    %528 = vector.extract_strided_slice %505 {offsets = [0, 0], sizes = [4, 64], strides = [1, 1]} : vector<8x64xf32> to vector<4x64xf32>
    %cst_137 = arith.constant dense<0xFF800000> : vector<64xf32>
    %529 = vector.multi_reduction <maximumf>, %528, %cst_137 [0] : vector<4x64xf32> to vector<64xf32>
    %530 = vector.shape_cast %529 : vector<64xf32> to vector<1x64xf32>
    %531 = vector.extract_strided_slice %505 {offsets = [4, 0], sizes = [4, 64], strides = [1, 1]} : vector<8x64xf32> to vector<4x64xf32>
    %cst_138 = arith.constant dense<0xFF800000> : vector<64xf32>
    %532 = vector.multi_reduction <maximumf>, %531, %cst_138 [0] : vector<4x64xf32> to vector<64xf32>
    %533 = vector.shape_cast %532 : vector<64xf32> to vector<1x64xf32>
    %534 = tpu.concatenate %530, %533 in 0 : vector<1x64xf32>, vector<1x64xf32> -> vector<2x64xf32>
    %535 = vector.extract_strided_slice %534 {offsets = [0, 0], sizes = [2, 4], strides = [1, 1]} : vector<2x64xf32> to vector<2x4xf32>
    %536 = vector.extract_strided_slice %534 {offsets = [0, 8], sizes = [2, 4], strides = [1, 1]} : vector<2x64xf32> to vector<2x4xf32>
    %537 = arith.maximumf %535, %536 : vector<2x4xf32>
    %538 = vector.extract_strided_slice %534 {offsets = [0, 16], sizes = [2, 4], strides = [1, 1]} : vector<2x64xf32> to vector<2x4xf32>
    %539 = arith.maximumf %537, %538 : vector<2x4xf32>
    %540 = vector.extract_strided_slice %534 {offsets = [0, 24], sizes = [2, 4], strides = [1, 1]} : vector<2x64xf32> to vector<2x4xf32>
    %541 = arith.maximumf %539, %540 : vector<2x4xf32>
    %cst_139 = arith.constant dense<0xFF800000> : vector<2xf32>
    %542 = vector.multi_reduction <maximumf>, %541, %cst_139 [1] : vector<2x4xf32> to vector<2xf32>
    %543 = vector.shape_cast %542 : vector<2xf32> to vector<2x1xf32>
    %544 = vector.extract_strided_slice %534 {offsets = [0, 4], sizes = [2, 4], strides = [1, 1]} : vector<2x64xf32> to vector<2x4xf32>
    %545 = vector.extract_strided_slice %534 {offsets = [0, 12], sizes = [2, 4], strides = [1, 1]} : vector<2x64xf32> to vector<2x4xf32>
    %546 = arith.maximumf %544, %545 : vector<2x4xf32>
    %547 = vector.extract_strided_slice %534 {offsets = [0, 20], sizes = [2, 4], strides = [1, 1]} : vector<2x64xf32> to vector<2x4xf32>
    %548 = arith.maximumf %546, %547 : vector<2x4xf32>
    %549 = vector.extract_strided_slice %534 {offsets = [0, 28], sizes = [2, 4], strides = [1, 1]} : vector<2x64xf32> to vector<2x4xf32>
    %550 = arith.maximumf %548, %549 : vector<2x4xf32>
    %cst_140 = arith.constant dense<0xFF800000> : vector<2xf32>
    %551 = vector.multi_reduction <maximumf>, %550, %cst_140 [1] : vector<2x4xf32> to vector<2xf32>
    %552 = vector.shape_cast %551 : vector<2xf32> to vector<2x1xf32>
    %553 = vector.extract_strided_slice %534 {offsets = [0, 32], sizes = [2, 4], strides = [1, 1]} : vector<2x64xf32> to vector<2x4xf32>
    %554 = vector.extract_strided_slice %534 {offsets = [0, 40], sizes = [2, 4], strides = [1, 1]} : vector<2x64xf32> to vector<2x4xf32>
    %555 = arith.maximumf %553, %554 : vector<2x4xf32>
    %556 = vector.extract_strided_slice %534 {offsets = [0, 48], sizes = [2, 4], strides = [1, 1]} : vector<2x64xf32> to vector<2x4xf32>
    %557 = arith.maximumf %555, %556 : vector<2x4xf32>
    %558 = vector.extract_strided_slice %534 {offsets = [0, 56], sizes = [2, 4], strides = [1, 1]} : vector<2x64xf32> to vector<2x4xf32>
    %559 = arith.maximumf %557, %558 : vector<2x4xf32>
    %cst_141 = arith.constant dense<0xFF800000> : vector<2xf32>
    %560 = vector.multi_reduction <maximumf>, %559, %cst_141 [1] : vector<2x4xf32> to vector<2xf32>
    %561 = vector.shape_cast %560 : vector<2xf32> to vector<2x1xf32>
    %562 = vector.extract_strided_slice %534 {offsets = [0, 36], sizes = [2, 4], strides = [1, 1]} : vector<2x64xf32> to vector<2x4xf32>
    %563 = vector.extract_strided_slice %534 {offsets = [0, 44], sizes = [2, 4], strides = [1, 1]} : vector<2x64xf32> to vector<2x4xf32>
    %564 = arith.maximumf %562, %563 : vector<2x4xf32>
    %565 = vector.extract_strided_slice %534 {offsets = [0, 52], sizes = [2, 4], strides = [1, 1]} : vector<2x64xf32> to vector<2x4xf32>
    %566 = arith.maximumf %564, %565 : vector<2x4xf32>
    %567 = vector.extract_strided_slice %534 {offsets = [0, 60], sizes = [2, 4], strides = [1, 1]} : vector<2x64xf32> to vector<2x4xf32>
    %568 = arith.maximumf %566, %567 : vector<2x4xf32>
    %cst_142 = arith.constant dense<0xFF800000> : vector<2xf32>
    %569 = vector.multi_reduction <maximumf>, %568, %cst_142 [1] : vector<2x4xf32> to vector<2xf32>
    %570 = vector.shape_cast %569 : vector<2xf32> to vector<2x1xf32>
    %571 = tpu.concatenate %543, %552, %561, %570 in 1 : vector<2x1xf32>, vector<2x1xf32>, vector<2x1xf32>, vector<2x1xf32> -> vector<2x4xf32>
    %c0_143 = arith.constant 0 : index
    %c3_144 = arith.constant 3 : index
    %c0_145 = arith.constant 0 : index
    %c0_146 = arith.constant 0 : index
    %572 = vector.load %arg3[%c0_143, %c3_144, %c0_145, %c0_146] : memref<1x4x2x4xf32, #tpu.memory_space<vmem>>, vector<1x1x2x4xf32>
    %573 = vector.shape_cast %572 : vector<1x1x2x4xf32> to vector<2x4xf32>
    %574 = vector.shape_cast %571 : vector<2x4xf32> to vector<1x1x2x4xf32>
    tpu.vector_store %arg3[%c0_143, %c3_144, %c0_145, %c0_146], %574 {strides = array<i32>} : memref<1x4x2x4xf32, #tpu.memory_space<vmem>>, vector<1x1x2x4xf32>,
    %575 = vector.extract_strided_slice %505 {offsets = [0, 0], sizes = [2, 64], strides = [1, 1]} : vector<8x64xf32> to vector<2x64xf32>
    %cst_147 = arith.constant dense<0xFF800000> : vector<64xf32>
    %576 = vector.multi_reduction <maximumf>, %575, %cst_147 [0] : vector<2x64xf32> to vector<64xf32>
    %577 = vector.shape_cast %576 : vector<64xf32> to vector<1x64xf32>
    %578 = vector.extract_strided_slice %505 {offsets = [2, 0], sizes = [2, 64], strides = [1, 1]} : vector<8x64xf32> to vector<2x64xf32>
    %cst_148 = arith.constant dense<0xFF800000> : vector<64xf32>
    %579 = vector.multi_reduction <maximumf>, %578, %cst_148 [0] : vector<2x64xf32> to vector<64xf32>
    %580 = vector.shape_cast %579 : vector<64xf32> to vector<1x64xf32>
    %581 = vector.extract_strided_slice %505 {offsets = [4, 0], sizes = [2, 64], strides = [1, 1]} : vector<8x64xf32> to vector<2x64xf32>
    %cst_149 = arith.constant dense<0xFF800000> : vector<64xf32>
    %582 = vector.multi_reduction <maximumf>, %581, %cst_149 [0] : vector<2x64xf32> to vector<64xf32>
    %583 = vector.shape_cast %582 : vector<64xf32> to vector<1x64xf32>
    %584 = vector.extract_strided_slice %505 {offsets = [6, 0], sizes = [2, 64], strides = [1, 1]} : vector<8x64xf32> to vector<2x64xf32>
    %cst_150 = arith.constant dense<0xFF800000> : vector<64xf32>
    %585 = vector.multi_reduction <maximumf>, %584, %cst_150 [0] : vector<2x64xf32> to vector<64xf32>
    %586 = vector.shape_cast %585 : vector<64xf32> to vector<1x64xf32>
    %587 = tpu.concatenate %577, %580, %583, %586 in 0 : vector<1x64xf32>, vector<1x64xf32>, vector<1x64xf32>, vector<1x64xf32> -> vector<4x64xf32>
    %588 = vector.extract_strided_slice %587 {offsets = [0, 0], sizes = [4, 2], strides = [1, 1]} : vector<4x64xf32> to vector<4x2xf32>
    %589 = vector.extract_strided_slice %587 {offsets = [0, 8], sizes = [4, 2], strides = [1, 1]} : vector<4x64xf32> to vector<4x2xf32>
    %590 = arith.maximumf %588, %589 : vector<4x2xf32>
    %cst_151 = arith.constant dense<0xFF800000> : vector<4xf32>
    %591 = vector.multi_reduction <maximumf>, %590, %cst_151 [1] : vector<4x2xf32> to vector<4xf32>
    %592 = vector.shape_cast %591 : vector<4xf32> to vector<4x1xf32>
    %593 = vector.extract_strided_slice %587 {offsets = [0, 2], sizes = [4, 2], strides = [1, 1]} : vector<4x64xf32> to vector<4x2xf32>
    %594 = vector.extract_strided_slice %587 {offsets = [0, 10], sizes = [4, 2], strides = [1, 1]} : vector<4x64xf32> to vector<4x2xf32>
    %595 = arith.maximumf %593, %594 : vector<4x2xf32>
    %cst_152 = arith.constant dense<0xFF800000> : vector<4xf32>
    %596 = vector.multi_reduction <maximumf>, %595, %cst_152 [1] : vector<4x2xf32> to vector<4xf32>
    %597 = vector.shape_cast %596 : vector<4xf32> to vector<4x1xf32>
    %598 = vector.extract_strided_slice %587 {offsets = [0, 4], sizes = [4, 2], strides = [1, 1]} : vector<4x64xf32> to vector<4x2xf32>
    %599 = vector.extract_strided_slice %587 {offsets = [0, 12], sizes = [4, 2], strides = [1, 1]} : vector<4x64xf32> to vector<4x2xf32>
    %600 = arith.maximumf %598, %599 : vector<4x2xf32>
    %cst_153 = arith.constant dense<0xFF800000> : vector<4xf32>
    %601 = vector.multi_reduction <maximumf>, %600, %cst_153 [1] : vector<4x2xf32> to vector<4xf32>
    %602 = vector.shape_cast %601 : vector<4xf32> to vector<4x1xf32>
    %603 = vector.extract_strided_slice %587 {offsets = [0, 6], sizes = [4, 2], strides = [1, 1]} : vector<4x64xf32> to vector<4x2xf32>
    %604 = vector.extract_strided_slice %587 {offsets = [0, 14], sizes = [4, 2], strides = [1, 1]} : vector<4x64xf32> to vector<4x2xf32>
    %605 = arith.maximumf %603, %604 : vector<4x2xf32>
    %cst_154 = arith.constant dense<0xFF800000> : vector<4xf32>
    %606 = vector.multi_reduction <maximumf>, %605, %cst_154 [1] : vector<4x2xf32> to vector<4xf32>
    %607 = vector.shape_cast %606 : vector<4xf32> to vector<4x1xf32>
    %608 = vector.extract_strided_slice %587 {offsets = [0, 16], sizes = [4, 2], strides = [1, 1]} : vector<4x64xf32> to vector<4x2xf32>
    %609 = vector.extract_strided_slice %587 {offsets = [0, 24], sizes = [4, 2], strides = [1, 1]} : vector<4x64xf32> to vector<4x2xf32>
    %610 = arith.maximumf %608, %609 : vector<4x2xf32>
    %cst_155 = arith.constant dense<0xFF800000> : vector<4xf32>
    %611 = vector.multi_reduction <maximumf>, %610, %cst_155 [1] : vector<4x2xf32> to vector<4xf32>
    %612 = vector.shape_cast %611 : vector<4xf32> to vector<4x1xf32>
    %613 = vector.extract_strided_slice %587 {offsets = [0, 18], sizes = [4, 2], strides = [1, 1]} : vector<4x64xf32> to vector<4x2xf32>
    %614 = vector.extract_strided_slice %587 {offsets = [0, 26], sizes = [4, 2], strides = [1, 1]} : vector<4x64xf32> to vector<4x2xf32>
    %615 = arith.maximumf %613, %614 : vector<4x2xf32>
    %cst_156 = arith.constant dense<0xFF800000> : vector<4xf32>
    %616 = vector.multi_reduction <maximumf>, %615, %cst_156 [1] : vector<4x2xf32> to vector<4xf32>
    %617 = vector.shape_cast %616 : vector<4xf32> to vector<4x1xf32>
    %618 = vector.extract_strided_slice %587 {offsets = [0, 20], sizes = [4, 2], strides = [1, 1]} : vector<4x64xf32> to vector<4x2xf32>
    %619 = vector.extract_strided_slice %587 {offsets = [0, 28], sizes = [4, 2], strides = [1, 1]} : vector<4x64xf32> to vector<4x2xf32>
    %620 = arith.maximumf %618, %619 : vector<4x2xf32>
    %cst_157 = arith.constant dense<0xFF800000> : vector<4xf32>
    %621 = vector.multi_reduction <maximumf>, %620, %cst_157 [1] : vector<4x2xf32> to vector<4xf32>
    %622 = vector.shape_cast %621 : vector<4xf32> to vector<4x1xf32>
    %623 = vector.extract_strided_slice %587 {offsets = [0, 22], sizes = [4, 2], strides = [1, 1]} : vector<4x64xf32> to vector<4x2xf32>
    %624 = vector.extract_strided_slice %587 {offsets = [0, 30], sizes = [4, 2], strides = [1, 1]} : vector<4x64xf32> to vector<4x2xf32>
    %625 = arith.maximumf %623, %624 : vector<4x2xf32>
    %cst_158 = arith.constant dense<0xFF800000> : vector<4xf32>
    %626 = vector.multi_reduction <maximumf>, %625, %cst_158 [1] : vector<4x2xf32> to vector<4xf32>
    %627 = vector.shape_cast %626 : vector<4xf32> to vector<4x1xf32>
    %628 = vector.extract_strided_slice %587 {offsets = [0, 32], sizes = [4, 2], strides = [1, 1]} : vector<4x64xf32> to vector<4x2xf32>
    %629 = vector.extract_strided_slice %587 {offsets = [0, 40], sizes = [4, 2], strides = [1, 1]} : vector<4x64xf32> to vector<4x2xf32>
    %630 = arith.maximumf %628, %629 : vector<4x2xf32>
    %cst_159 = arith.constant dense<0xFF800000> : vector<4xf32>
    %631 = vector.multi_reduction <maximumf>, %630, %cst_159 [1] : vector<4x2xf32> to vector<4xf32>
    %632 = vector.shape_cast %631 : vector<4xf32> to vector<4x1xf32>
    %633 = vector.extract_strided_slice %587 {offsets = [0, 34], sizes = [4, 2], strides = [1, 1]} : vector<4x64xf32> to vector<4x2xf32>
    %634 = vector.extract_strided_slice %587 {offsets = [0, 42], sizes = [4, 2], strides = [1, 1]} : vector<4x64xf32> to vector<4x2xf32>
    %635 = arith.maximumf %633, %634 : vector<4x2xf32>
    %cst_160 = arith.constant dense<0xFF800000> : vector<4xf32>
    %636 = vector.multi_reduction <maximumf>, %635, %cst_160 [1] : vector<4x2xf32> to vector<4xf32>
    %637 = vector.shape_cast %636 : vector<4xf32> to vector<4x1xf32>
    %638 = vector.extract_strided_slice %587 {offsets = [0, 36], sizes = [4, 2], strides = [1, 1]} : vector<4x64xf32> to vector<4x2xf32>
    %639 = vector.extract_strided_slice %587 {offsets = [0, 44], sizes = [4, 2], strides = [1, 1]} : vector<4x64xf32> to vector<4x2xf32>
    %640 = arith.maximumf %638, %639 : vector<4x2xf32>
    %cst_161 = arith.constant dense<0xFF800000> : vector<4xf32>
    %641 = vector.multi_reduction <maximumf>, %640, %cst_161 [1] : vector<4x2xf32> to vector<4xf32>
    %642 = vector.shape_cast %641 : vector<4xf32> to vector<4x1xf32>
    %643 = vector.extract_strided_slice %587 {offsets = [0, 38], sizes = [4, 2], strides = [1, 1]} : vector<4x64xf32> to vector<4x2xf32>
    %644 = vector.extract_strided_slice %587 {offsets = [0, 46], sizes = [4, 2], strides = [1, 1]} : vector<4x64xf32> to vector<4x2xf32>
    %645 = arith.maximumf %643, %644 : vector<4x2xf32>
    %cst_162 = arith.constant dense<0xFF800000> : vector<4xf32>
    %646 = vector.multi_reduction <maximumf>, %645, %cst_162 [1] : vector<4x2xf32> to vector<4xf32>
    %647 = vector.shape_cast %646 : vector<4xf32> to vector<4x1xf32>
    %648 = vector.extract_strided_slice %587 {offsets = [0, 48], sizes = [4, 2], strides = [1, 1]} : vector<4x64xf32> to vector<4x2xf32>
    %649 = vector.extract_strided_slice %587 {offsets = [0, 56], sizes = [4, 2], strides = [1, 1]} : vector<4x64xf32> to vector<4x2xf32>
    %650 = arith.maximumf %648, %649 : vector<4x2xf32>
    %cst_163 = arith.constant dense<0xFF800000> : vector<4xf32>
    %651 = vector.multi_reduction <maximumf>, %650, %cst_163 [1] : vector<4x2xf32> to vector<4xf32>
    %652 = vector.shape_cast %651 : vector<4xf32> to vector<4x1xf32>
    %653 = vector.extract_strided_slice %587 {offsets = [0, 50], sizes = [4, 2], strides = [1, 1]} : vector<4x64xf32> to vector<4x2xf32>
    %654 = vector.extract_strided_slice %587 {offsets = [0, 58], sizes = [4, 2], strides = [1, 1]} : vector<4x64xf32> to vector<4x2xf32>
    %655 = arith.maximumf %653, %654 : vector<4x2xf32>
    %cst_164 = arith.constant dense<0xFF800000> : vector<4xf32>
    %656 = vector.multi_reduction <maximumf>, %655, %cst_164 [1] : vector<4x2xf32> to vector<4xf32>
    %657 = vector.shape_cast %656 : vector<4xf32> to vector<4x1xf32>
    %658 = vector.extract_strided_slice %587 {offsets = [0, 52], sizes = [4, 2], strides = [1, 1]} : vector<4x64xf32> to vector<4x2xf32>
    %659 = vector.extract_strided_slice %587 {offsets = [0, 60], sizes = [4, 2], strides = [1, 1]} : vector<4x64xf32> to vector<4x2xf32>
    %660 = arith.maximumf %658, %659 : vector<4x2xf32>
    %cst_165 = arith.constant dense<0xFF800000> : vector<4xf32>
    %661 = vector.multi_reduction <maximumf>, %660, %cst_165 [1] : vector<4x2xf32> to vector<4xf32>
    %662 = vector.shape_cast %661 : vector<4xf32> to vector<4x1xf32>
    %663 = vector.extract_strided_slice %587 {offsets = [0, 54], sizes = [4, 2], strides = [1, 1]} : vector<4x64xf32> to vector<4x2xf32>
    %664 = vector.extract_strided_slice %587 {offsets = [0, 62], sizes = [4, 2], strides = [1, 1]} : vector<4x64xf32> to vector<4x2xf32>
    %665 = arith.maximumf %663, %664 : vector<4x2xf32>
    %cst_166 = arith.constant dense<0xFF800000> : vector<4xf32>
    %666 = vector.multi_reduction <maximumf>, %665, %cst_166 [1] : vector<4x2xf32> to vector<4xf32>
    %667 = vector.shape_cast %666 : vector<4xf32> to vector<4x1xf32>
    %668 = tpu.concatenate %592, %597, %602, %607, %612, %617, %622, %627, %632, %637, %642, %647, %652, %657, %662, %667 in 1 : vector<4x1xf32>, vector<4x1xf32>, vector<4x1xf32>, vector<4x1xf32>, vector<4x1xf32>, vector<4x1xf32>, vector<4x1xf32>, vector<4x1xf32>, vector<4x1xf32>, vector<4x1xf32>, vector<4x1xf32>, vector<4x1xf32>, vector<4x1xf32>, vector<4x1xf32>, vector<4x1xf32>, vector<4x1xf32> -> vector<4x16xf32>
    %c0_167 = arith.constant 0 : index
    %c3_168 = arith.constant 3 : index
    %c0_169 = arith.constant 0 : index
    %c0_170 = arith.constant 0 : index
    %669 = vector.load %arg4[%c0_167, %c3_168, %c0_169, %c0_170] : memref<1x4x4x16xf32, #tpu.memory_space<vmem>>, vector<1x1x4x16xf32>
    %670 = vector.shape_cast %669 : vector<1x1x4x16xf32> to vector<4x16xf32>
    %671 = vector.shape_cast %668 : vector<4x16xf32> to vector<1x1x4x16xf32>
    tpu.vector_store %arg4[%c0_167, %c3_168, %c0_169, %c0_170], %671 {strides = array<i32>} : memref<1x4x4x16xf32, #tpu.memory_space<vmem>>, vector<1x1x4x16xf32>,
    return
  }
  func.func @transform_0(%arg0: i32) -> (i32, i32, i32, i32) {
    %c0_i32 = arith.constant 0 : i32
    %c0_i32_0 = arith.constant 0 : i32
    %c0_i32_1 = arith.constant 0 : i32
    %c0_i32_2 = arith.constant 0 : i32
    return %arg0, %c0_i32, %c0_i32_0, %c0_i32_1 : i32, i32, i32, i32
  }
  func.func @transform_1(%arg0: i32) -> (i32, i32, i32, i32) {
    %c0_i32 = arith.constant 0 : i32
    %c0_i32_0 = arith.constant 0 : i32
    %c0_i32_1 = arith.constant 0 : i32
    %c0_i32_2 = arith.constant 0 : i32
    return %arg0, %c0_i32, %c0_i32_0, %c0_i32_1 : i32, i32, i32, i32
  }
  func.func @transform_2(%arg0: i32) -> (i32, i32, i32, i32) {
    %c0_i32 = arith.constant 0 : i32
    %c0_i32_0 = arith.constant 0 : i32
    %c0_i32_1 = arith.constant 0 : i32
    %c0_i32_2 = arith.constant 0 : i32
    return %arg0, %c0_i32, %c0_i32_0, %c0_i32_1 : i32, i32, i32, i32
  }
  func.func @transform_3(%arg0: i32) -> (i32, i32, i32, i32) {
    %c0_i32 = arith.constant 0 : i32
    %c0_i32_0 = arith.constant 0 : i32
    %c0_i32_1 = arith.constant 0 : i32
    %c0_i32_2 = arith.constant 0 : i32
    return %arg0, %c0_i32, %c0_i32_0, %c0_i32_1 : i32, i32, i32, i32
  }
}

</mosaic_0001>

<bundles_post_ra>
// kernel: tpu_custom_call.1
= control target key start
LH: loop header
LB: loop body
LE: loop exit
PB: predicated region body
PF: predicated region fallthrough
CT: control target
= control target key end

     0   :  { %9 = vsyncpa [#allocation3], 0  ;;  %s2072_s0 = inlined_call_operand.hbm [shape: f32[2,4,8,64], index: 0, kind: input, shape index: {}]   ;;  %s2073_s1 = inlined_call_operand.vmem [shape: f32[2,4,1,1], index: 1, kind: output, shape index: {0}]   ;;  %s2074_s2 = inlined_call_operand.hbm [shape: f32[2,4,2,4], index: 2, kind: output, shape index: {1}]   ;;  %s2075_s3 = inlined_call_operand.hbm [shape: f32[2,4,4,16], index: 3, kind: output, shape index: {2}]  }
   0x1   :  { %11 = vsyncpa [#allocation3 + $0x1], 0 }
   0x2   :  { %12 = vsyncpa [#allocation4], 0 }
   0x3   :  { %14 = vsyncpa [#allocation4 + $0x1], 0 }
   0x4   :  { %15 = vsyncpa [#allocation7], 0 }
   0x5   :  { %17 = vsyncpa [#allocation7 + $0x1], 0  ;;  %s1445_s12 = smov 0   ;;  %s1447_s13 = smov 0  }
   0x6   :  { %s1449_s14 = smov 0   ;;  %s1451_s15 = smov 0  }
   0x7 LB: > { %s1466_s16 = sadd.s32 4294967295, %s1407_s15   ;;  %s1181_s17 = sadd.s32 4294967294, %s1407_s15   ;;  %s1407_s15 = sphi %s1451_s15, %s2227_s15   ;;  %s1403_s14 = sphi %s1449_s14, %s2226_s14   ;;  %s1399_s13 = sphi %s1447_s13, %s2225_s13   ;;  %s1395_s12 = sphi %s1445_s12, %s2224_s12  }
   0x8   : > { %s1470_s18 = sadd.s32 1, %s1407_s15   ;;  %s30_s19 = sadd.s32 1, %s1403_s14 }
   0x9   : > { %s27_s20 = ssub.s32 %s1407_s15, %s1470_s18  ;;  %p37_p0 = scmp.ne.s32.totalorder %s1403_s14, %s1399_s13 }
   0xa   : > { %p28_p1 = scmp.eq.s32.totalorder %s27_s20, 0  ;;  %p38_p2 = scmp.eq.s32.totalorder %s1407_s15, 0 }
   0xb   : > { %p43_p3 = scmp.ne.s32.totalorder %s1399_s13, %s1395_s12  ;;  %p44_p4 = scmp.eq.s32.totalorder %s1466_s16, 0 }
   0xc   : > { %s1482_s21 = scalar_select %p28_p1, %s1403_s14, %s30_s19  }
   0xd   : > { %p1484_p5 = por %p38_p2, %p37_p0  ;;  %p1488_p6 = por %p44_p4, %p43_p3 }
   0xe   : > { %p93_p7 = scmp.eq.s32.totalorder %s1466_s16, 1  ;;  %p99_p8 = scmp.eq.s32.totalorder %s1181_s17, 1 }
   0xf   : > { %p1232_p10 = scmp.lt.s32.totalorder %s1407_s15, 2  ;;  %s145_s26 = sand.u32 1, %s1403_s14  }
  0x10   : > { %p1495_p11 = por %p93_p7, %p37_p0  ;;  %p1499_p12 = por %p99_p8, %p43_p3 }
  0x11   : > { %s1212_s27 = sshll.u32 %s1407_s15, 9  ;;  %s1184_s28 = sshll.u32 %s145_s26, 5 }
  0x12   : > { %s2118_s24 = scalar_select %p1495_p11, 1, 0 }
  0x13   : > { %s2119_s25 = scalar_select %p1499_p12, 1, 0 }
  0x14   : > { %s1508_s4 = scalar_lea.hbm %s2072_s0, %s1212_s27  ;;  %s149_s5 = scalar_lea.vmem [#allocation2], %s1184_s28 }
  0x15   : > { %s156_s6 = sshll.u32 %s149_s5, 4  ;;  %p1512_p13 = pnand %p1232_p10, %p1484_p5  ;;  %s1516_s6 = int_to_ptr.vmem [resolvable:$true] %s156_s6 }
  0x16   : > { %s1518_s8 = scalar_lea.sflag [#allocation3], %s145_s26  ;;  %s1279_s9 = scalar_lea.hbm %s1508_s4, 512 }
  0x17   : > { %p1280_p0 = scmp.ne.s32.totalorder %s1508_s4, %s1279_s9  ;;  %p1281_p1 = pneg %p1512_p13 }
  0x18   : > { %s1284_s17 = scalar_lea.hbm %s2072_s0, 1024  ;;  %p1285_p4 = scmp.lt.u32.totalorder %s1508_s4, %s2072_s0 }
  0x19   : > { %p1282_p2 = pnand %p1281_p1, %p1280_p0  ;;  %p1286_p5 = scmp.lt.u32.totalorder %s1284_s17, %s1279_s9 }
  0x1a   : > { %p1288_p8 = scmp.lt.u32.totalorder %s1279_s9, %s1508_s4 }
  0x1b   : > { %p1283_p3 = pneg %p1282_p2  ;;  %p1287_p7 = por %p1286_p5, %p1285_p4 }
  0x1d   : > { %p1289_p10 = por %p1288_p8, %p1287_p7 }
  0x1f   : > { %p1290_p9 = pnand %p1289_p10, %p1283_p3 }
  0x21   : > { %1293 = shalt.err (!%p1290_p9)
}
  0x22   : > { %s1294_s22 = scalar_lea.vmem %s1516_s6, 512  ;;  %s1409_s26 = smov [#allocation2]  }
  0x23   : > { %p1295_p0 = scmp.ne.s32.totalorder %s1516_s6, %s1294_s22  ;;  %s1299_s27 = sshll.u32 %s1409_s26, 4  ;;  %s1300_s27 = int_to_ptr.vmem [resolvable:$false] %s1299_s27 }
  0x24   : > { %s1301_s28 = scalar_lea.vmem %s1300_s27, 1024  ;;  %p1302_p11 = scmp.lt.s32.totalorder %s1516_s6, %s1300_s27 }
  0x25   : > { %p1297_p2 = pnand %p1295_p0, %p1281_p1  ;;  %p1303_p4 = scmp.lt.s32.totalorder %s1301_s28, %s1294_s22 }
  0x27   : > { %p1298_p12 = pneg %p1297_p2  ;;  %p1304_p5 = por %p1303_p4, %p1302_p11 }
  0x29   : > { %p1305_p7 = pnand %p1304_p5, %p1298_p12 }
  0x2b   : > { %1308 = shalt.err (!%p1305_p7)
}
  0x2c   : > { %s1410_s29 = smov 128   ;;  %s1411_s30 = smov 8  }
  0x2d   : > { %1224 = dma.hbm_to_vmem [thread:$0]  (!%p1512_p13), %s1508_s4, 512, %s1516_s6, %s1518_s8, %s1410_s29, %s1410_s29, %s1411_s30  }
  0x2e   : > { %p1187_p9 = scmp.ge.s32.totalorder %s1407_s15, 1  ;;  %p164_p1 = scmp.lt.s32.totalorder %s1407_s15, 3 }
  0x30   : > { %p165_p3 = pnand %p1187_p9, %p164_p1 }
  0x31   : > { %s1549_s5 = sand.u32 (!%p165_p3), 1, %s1399_s13  }
  0x32   : > { %168 = sbr.rel (%p165_p3) target bundleno = 1297 (0x511), region = 24  ;;  %s1188_s9 = sshll.u32 (!%p165_p3), %s1549_s5, 5 }
  0x33   : > { %s171_s10 = scalar_lea.sflag (!%p165_p3), [#allocation3], %s1549_s5  ;;  %s1553_s11 = scalar_lea.vmem (!%p165_p3), [#allocation2], %s1188_s9 }
  0x39   : > { %1382 = dma.done.wait (%p1488_p6), %s171_s10, 512  }
  0x3a   : > { %1384 = vsyncadd (%p1488_p6), %s171_s10, 4294966784  ;;  %vm2111_vm0 = vcmask 523264   ;;  %vm2078_vm1 = vcmask 519168   ;;  %vm2077_vm2 = vcmask 523268   ;;  %v210_v0 = vld [vmem:[%s1553_s11] sm:$0xff]  ;;  %v1561_v1 = vld [vmem:[%s1553_s11 + $0x8] sm:$0xff] }
  0x3b   : > { %v212_v2 = vsel %vm2111_vm0, %v210_v0, -inf  ;;  %v255_v3 = vsel %vm2078_vm1, %v210_v0, -inf  ;;  %v263_v4 = vsel %vm2077_vm2, %v210_v0, -inf  ;;  %vm2099_vm3 = vcmask 517120   ;;  %s1412_s23 = smov 120   ;;  %s1413_s4 = smov 104  }
  0x3c   : > { %v213_v5 = vrot.slane %v212_v2, 4  ;;  %v256_v6 = vrot.slane %v255_v3, 4  ;;  %v264_v7 = vrot.slane %v263_v4, 4  ;;  %vm2098_vm4 = vcmask 519170   ;;  %s1414_s6 = smov 112   ;;  %s1415_s7 = smov 96  }
  0x3d   : > { %v445_v8 = vsel %vm2111_vm0, %v1561_v1, -inf  ;;  %v309_v12 = vsel %vm2099_vm3, %v210_v0, -inf  ;;  %v317_v13 = vsel %vm2098_vm4, %v210_v0, -inf  ;;  %vm2094_vm5 = vcmask 521220   ;;  %s1416_s8 = smov 88   ;;  %s1417_s17 = smov 80  }
  0x3e   : > { %v214_v9 = vmax.f32 %v212_v2, %v213_v5  ;;  %v446_v10 = vrot.slane %v445_v8, 4  ;;  %v257_v14 = vmax.f32 %v255_v3, %v256_v6  ;;  %v265_v15 = vmax.f32 %v263_v4, %v264_v7  ;;  %s1418_s19 = smov 72   ;;  %s1190_s20 = sshll.u32 %s1549_s5, 4 }
  0x3f   : > { %v310_v18 = vrot.slane %v309_v12, 4  ;;  %v318_v19 = vrot.slane %v317_v13, 4  ;;  %v325_v20 = vsel %vm2094_vm5, %v210_v0, -inf  ;;  %vm2093_vm6 = vcmask 523270   ;;  %s1726_s22 = scalar_lea.vmem [#allocation6], %s1190_s20  ;;  %p206_p6 = scmp.lt.s32.totalorder %s1466_s16, 1 }
  0x40   : > { %v215_v11 = vrot.slane %v214_v9, 2  ;;  %v447_v16 = vmax.f32 %v445_v8, %v446_v10  ;;  %v258_v23 = vrot.slane %v257_v14, 2  ;;  %v266_v24 = vrot.slane %v265_v15, 2  ;;  %s1189_s27 = sshll.u32 %s1549_s5, 3  ;;  %p2217_p12 = scmp.ne.s32.totalorder %s2118_s24, 0 }
  0x41   : > { %v326_v26 = vrot.slane %v325_v20, 4  ;;  %v333_v27 = vsel %vm2093_vm6, %v210_v0, -inf  ;;  %v311_v28 = vmax.f32 %v309_v12, %v310_v18  ;;  %v319_v29 = vmax.f32 %v317_v13, %v318_v19  ;;  %s207_s26 = scalar_select %p206_p6, %s1466_s16, 1 }
  0x42   : > { %v216_v17 = vmax.f32 %v214_v9, %v215_v11  ;;  %v448_v22 = vrot.slane %v447_v16, 2  ;;  %v259_v31 = vmax.f32 %v257_v14, %v258_v23  ;;  %v267_v32 = vmax.f32 %v265_v15, %v266_v24  ;;  %s1737_s29 = scalar_lea.vmem [#allocation5], %s1189_s27 }
  0x43   : > { %v334_v33 = vrot.slane %v333_v27, 4  ;;  %v327_v34 = vmax.f32 %v325_v20, %v326_v26  ;;  %v312_v35 = vrot.slane %v311_v28, 2  ;;  %v320_v36 = vrot.slane %v319_v29, 2  ;;  %s1191_s28 = sshll.u32 %s207_s26, 2  ;;  %s1419_s26 = smov [#allocation5]  }
  0x44   : > { %v217_v21 = vrot.slane %v216_v17, 1  ;;  %v449_v30 = vmax.f32 %v447_v16, %v448_v22  ;;  %v260_v38 = vrot.slane %v259_v31, 1  ;;  %v268_v39 = vrot.slane %v267_v32, 1  ;;  %s1744_s10 = scalar_lea.vmem %s2073_s1, %s1191_s28  ;;  %s1313_s27 = sshll.u32 %s1419_s26, 4  ;;  %s1314_s27 = int_to_ptr.vmem [resolvable:$false] %s1313_s27 }
  0x45   : > { %v335_v40 = vmax.f32 %v333_v27, %v334_v33  ;;  %v328_v41 = vrot.slane %v327_v34, 2  ;;  %v313_v42 = vmax.f32 %v311_v28, %v312_v35  ;;  %v321_v43 = vmax.f32 %v319_v29, %v320_v36  ;;  %s1315_s28 = scalar_lea.vmem %s1314_s27, 256 }
  0x46   : > { %v1571_v25 = vmax.f32 %v216_v17, %v217_v21  ;;  %v450_v37 = vrot.slane %v449_v30, 1  ;;  %v261_v45 = vmax.f32 %v259_v31, %v260_v38  ;;  %v269_v46 = vmax.f32 %v267_v32, %v268_v39 }
  0x47   : > { %v336_v47 = vrot.slane %v335_v40, 2  ;;  %vm2101_vm7 = vcmask 1040384   ;;  %v329_v48 = vmax.f32 %v327_v34, %v328_v41  ;;  %v314_v49 = vrot.slane %v313_v42, 1 }
  0x48   : > { %220 = vrot.lane.b32.xlu0 %v1571_v25, %s1412_s23  ;;  %228 = vrot.lane.b32.xlu1 %v1571_v25, %s1413_s4  ;;  %v1586_v44 = vmax.f32 %v449_v30, %v450_v37  ;;  %v322_v50 = vrot.slane %v321_v43, 1  ;;  %v271_v51 = vsel %vm2101_vm7, %v261_v45, %v269_v46  ;;  %vm2103_vm8 = vcmask 1041408  }
  0x49   : > { %v337_v52 = vmax.f32 %v335_v40, %v336_v47  ;;  %v330_v53 = vrot.slane %v329_v48, 1  ;;  %v315_v54 = vmax.f32 %v313_v42, %v314_v49  ;;  %vm2105_vm9 = vcmask 1042432  }
  0x4a   : > { %v323_v55 = vmax.f32 %v321_v43, %v322_v50  ;;  %vm2079_vm10 = vcmask 175264   ;;  %vm2114_vm11 = vcmask 11264   ;;  %v486_v11 = vsel %vm2078_vm1, %v1561_v1, -inf }
  0x4b   : > { %v338_v56 = vrot.slane %v337_v52, 1  ;;  %v331_v57 = vmax.f32 %v329_v48, %v330_v53  ;;  %vm2100_vm12 = vcmask 437664   ;;  %vm2088_vm13 = vcmask 27664  }
  0x4c   : > { %224 = vrot.lane.b32.xlu0 %v1571_v25, %s1414_s6  ;;  %232 = vrot.lane.b32.xlu1 %v1571_v25, %s1415_s7  ;;  %v340_v58 = vsel %vm2101_vm7, %v315_v54, %v323_v55  ;;  %v493_v12 = vsel %vm2077_vm2, %v1561_v1, -inf  ;;  %v487_v14 = vrot.slane %v486_v11, 4  ;;  %vm2112_vm14 = vcmask 25600  }
  0x4d   : > { %v339_v59 = vmax.f32 %v337_v52, %v338_v56  ;;  %v342_v60 = vsel %vm2103_vm8, %v340_v58, %v331_v57  ;;  %v494_v18 = vrot.slane %v493_v12, 4  ;;  %vm2080_vm15 = vcmask 44064  }
  0x4e   : > { %v488_v21 = vmax.f32 %v486_v11, %v487_v14  ;;  %vm2081_vm2 = vcmask 60464   ;;  %vm2113_vm1 = vcmask 142464  }
  0x4f   : > { %v344_v61 = vsel %vm2105_vm9, %v342_v60, %v339_v59  ;;  %v495_v22 = vmax.f32 %v493_v12, %v494_v18 }
  0x50   : > { %236 = vrot.lane.b32.xlu0 %v1571_v25, %s1416_s8  ;;  %240 = vrot.lane.b32.xlu1 %v1571_v25, %s1417_s17  ;;  %v489_v24 = vrot.slane %v488_v21, 2 }
  0x51   : > { %v496_v26 = vrot.slane %v495_v22, 2 }
  0x52   : > { %v490_v28 = vmax.f32 %v488_v21, %v489_v24  ;;  %v545_v21 = vsel %vm2094_vm5, %v1561_v1, -inf  ;;  %vm305_vm5 = vcmask 23552  }
  0x53   : > { %v497_v29 = vmax.f32 %v495_v22, %v496_v26  ;;  %v546_v22 = vrot.slane %v545_v21, 4 }
  0x54   : > { %244 = vrot.lane.b32.xlu0 %v1571_v25, %s1418_s19  ;;  %457 = vrot.lane.b32.xlu1 %v1586_v44, %s1414_s6  ;;  %v491_v31 = vrot.slane %v490_v28, 1 }
  0x55   : > { %v498_v32 = vrot.slane %v497_v29, 1 }
  0x56   : > { %v492_v35 = vmax.f32 %v490_v28, %v491_v31 }
  0x57   : > { %v499_v36 = vmax.f32 %v497_v29, %v498_v32  ;;  %v547_v32 = vmax.f32 %v545_v21, %v546_v22 }
  0x58   : > { %273 = vrot.lane.b32.xlu0 %v271_v51, %s1412_s23  ;;  %461 = vrot.lane.b32.xlu1 %v1586_v44, %s1413_s4 }
  0x59   : > { %v1651_v38 = vsel %vm2101_vm7, %v492_v35, %v499_v36 }
  0x5c   : > { %277 = vrot.lane.b32.xlu0 %v271_v51, %s1414_s6  ;;  %465 = vrot.lane.b32.xlu1 %v1586_v44, %s1415_s7 }
  0x60   : > { %281 = vrot.lane.b32.xlu0 %v271_v51, %s1413_s4  ;;  %473 = vrot.lane.b32.xlu1 %v1586_v44, %s1417_s17 }
  0x64   : > { %346 = vrot.lane.b32.xlu0 %v344_v61, %s1412_s23 }
  0x68   : > { %453 = vrot.lane.b32.xlu0 %v1586_v44, %s1412_s23 }
  0x6c   : > { %469 = vrot.lane.b32.xlu0 %v1586_v44, %s1416_s8 }
  0x70   : > { %477 = vrot.lane.b32.xlu0 %v1586_v44, %s1418_s19 }
  0xba   : > { %v1612_v62 = vpop.permute.xlu0 %220  ;;  %v229_v33 = vpop.permute.xlu1 %228 }
  0xbb   : > { %v223_v47 = vmax.f32 %v1571_v25, %v1612_v62 }
  0xbe   : > { %v1614_v63 = vpop.permute.xlu0 %224  ;;  %v233_v39 = vpop.permute.xlu1 %232 }
  0xbf   : > { %v227_v49 = vmax.f32 %v223_v47, %v1614_v63 }
  0xc1   : > { %v231_v53 = vmax.f32 %v227_v49, %v229_v33 }
  0xc2   : > { %v1616_v0 = vpop.permute.xlu0 %236  ;;  %v241_v41 = vpop.permute.xlu1 %240 }
  0xc3   : > { %v235_v25 = vmax.f32 %v231_v53, %v233_v39 }
  0xc5   : > { %v239_v59 = vmax.f32 %v235_v25, %v1616_v0 }
  0xc6   : > { %v1618_v2 = vpop.permute.xlu0 %244  ;;  %v458_v43 = vpop.permute.xlu1 %457 }
  0xc7   : > { %v243_v63 = vmax.f32 %v239_v59, %v241_v41 }
  0xca   : > { %v274_v3 = vpop.permute.xlu0 %273 }
  0xcb   : > { %v276_v8 = vmax.f32 %v271_v51, %v274_v3  ;;  %v462_v51 = vpop.permute.xlu1 %461 }
  0xce   : > { %v278_v4 = vpop.permute.xlu0 %277 }
  0xcf   : > { %v280_v13 = vmax.f32 %v276_v8, %v278_v4  ;;  %v466_v56 = vpop.permute.xlu1 %465 }
  0xd2   : > { %v282_v5 = vpop.permute.xlu0 %281 }
  0xd3   : > { %v1630_v15 = vmax.f32 %v280_v13, %v282_v5  ;;  %v474_v62 = vpop.permute.xlu1 %473 }
  0xd5   : > { %v286_v19 = vsel %vm2112_vm14, %v1630_v15, -inf }
  0xd6   : > { %v347_v6 = vpop.permute.xlu0 %346 }
  0xd7   : > { %v1620_v7 = vmax.f32 %v344_v61, %v347_v6  ;;  %v247_v6 = vmax.f32 %v243_v63, %v1618_v2 }
  0xd9   : > { %v375_v9 = vsel %vm2079_vm10, %v1620_v7, -inf  ;;  %v351_v10 = vsel %vm2114_vm11, %v1620_v7, -inf  ;;  %v407_v16 = vsel %vm2100_vm12, %v1620_v7, -inf  ;;  %v355_v17 = vsel %vm2088_vm13, %v1620_v7, -inf }
  0xda   : > { %376 = vmax.xlane.f32.xlu0 %v375_v9  ;;  %352 = vmax.xlane.f32.xlu1 %v351_v10  ;;  %v359_v20 = vsel %vm2080_vm15, %v1620_v7, -inf  ;;  %v363_v23 = vsel %vm2081_vm2, %v1620_v7, -inf  ;;  %v367_v27 = vsel %vm2113_vm1, %v1620_v7, -inf  ;;  %vm2082_vm10 = vcmask 158864   ;;  %v454_v45 = vpop.permute.xlu0 %453 }
  0xdb   : > { %v371_v30 = vsel %vm2082_vm10, %v1620_v7, -inf  ;;  %vm2083_vm15 = vcmask 191664   ;;  %vm2084_vm2 = vcmask 273664   ;;  %vm2085_vm10 = vcmask 290064  }
  0xdc   : > { %v379_v34 = vsel %vm2083_vm15, %v1620_v7, -inf  ;;  %v383_v37 = vsel %vm2084_vm2, %v1620_v7, -inf  ;;  %v387_v40 = vsel %vm2085_vm10, %v1620_v7, -inf  ;;  %vm2086_vm15 = vcmask 306464  }
  0xdd   : > { %v391_v42 = vsel %vm2086_vm15, %v1620_v7, -inf  ;;  %vm2087_vm2 = vcmask 322864   ;;  %vm2089_vm10 = vcmask 404864   ;;  %v456_v48 = vmax.f32 %v1586_v44, %v454_v45 }
  0xde   : > { %408 = vmax.xlane.f32.xlu0 %v407_v16  ;;  %356 = vmax.xlane.f32.xlu1 %v355_v17  ;;  %v395_v46 = vsel %vm2087_vm2, %v1620_v7, -inf  ;;  %v399_v50 = vsel %vm2089_vm10, %v1620_v7, -inf  ;;  %vm2090_vm15 = vcmask 421264   ;;  %vm2091_vm2 = vcmask 454064   ;;  %v470_v58 = vpop.permute.xlu0 %469 }
  0xdf   : > { %v460_v52 = vmax.f32 %v456_v48, %v458_v43  ;;  %v403_v54 = vsel %vm2090_vm15, %v1620_v7, -inf  ;;  %v411_v44 = vsel %vm2091_vm2, %v1620_v7, -inf  ;;  %vm2092_vm13 = vcmask 58400  }
  0xe0   : > { %v290_v60 = vsel %vm2092_vm13, %v1630_v15, -inf  ;;  %vm2095_vm10 = vcmask 288000   ;;  %vm2096_vm15 = vcmask 320800   ;;  %vm2097_vm2 = vcmask 57344  }
  0xe1   : > { %v464_v55 = vmax.f32 %v460_v52, %v462_v51  ;;  %v294_v3 = vsel %vm2095_vm10, %v1630_v15, -inf  ;;  %v298_v0 = vsel %vm2096_vm15, %v1630_v15, -inf  ;;  %v249_v8 = vsel %vm2097_vm2, %v247_v6, -inf }
  0xe2   : > { %287 = vmax.xlane.f32.xlu0 %v286_v19  ;;  %360 = vmax.xlane.f32.xlu1 %v359_v20  ;;  %v478_v5 = vpop.permute.xlu0 %477  ;;  %v531_v15 = vsel %vm2099_vm3, %v1561_v1, -inf  ;;  %v538_v16 = vsel %vm2098_vm4, %v1561_v1, -inf  ;;  %vm423_vm4 = vcmask 56320   ;;  %vm2106_vm3 = vcmask 64512  }
  0xe3   : > { %v468_v57 = vmax.f32 %v464_v55, %v466_v56  ;;  %v532_v19 = vrot.slane %v531_v15, 4  ;;  %v539_v20 = vrot.slane %v538_v16, 4  ;;  %vm2107_vm12 = vcmask 72704  }
  0xe5   : > { %v472_v61 = vmax.f32 %v468_v57, %v470_v58  ;;  %v540_v28 = vmax.f32 %v538_v16, %v539_v20 }
  0xe6   : > { %364 = vmax.xlane.f32.xlu1 %v363_v23  ;;  %v552_v23 = vsel %vm2093_vm6, %v1561_v1, -inf  ;;  %v548_v1 = vrot.slane %v547_v32, 2  ;;  %vm303_vm6 = vcmask 15360  }
  0xe7   : > { %v476_v4 = vmax.f32 %v472_v61, %v474_v62  ;;  %v541_v36 = vrot.slane %v540_v28, 2 }
  0xe8   : > { %v549_v48 = vmax.f32 %v547_v32, %v548_v1 }
  0xe9   : > { %v480_v7 = vmax.f32 %v476_v4, %v478_v5  ;;  %v542_v45 = vmax.f32 %v540_v28, %v541_v36 }
  0xea   : > { %368 = vmax.xlane.f32.xlu1 %v367_v27  ;;  %v533_v27 = vmax.f32 %v531_v15, %v532_v19  ;;  %v550_v53 = vrot.slane %v549_v48, 1 }
  0xeb   : > { %v481_v9 = vsel %vm2097_vm2, %v480_v7, -inf  ;;  %v543_v51 = vrot.slane %v542_v45, 1  ;;  %vm2104_vm2 = vcmask 48128  }
  0xec   : > { %v534_v35 = vrot.slane %v533_v27, 2  ;;  %v551_v57 = vmax.f32 %v549_v48, %v550_v53 }
  0xed   : > { %v544_v56 = vmax.f32 %v542_v45, %v543_v51 }
  0xee   : > { %372 = vmax.xlane.f32.xlu1 %v371_v30  ;;  %v553_v30 = vrot.slane %v552_v23, 4  ;;  %v535_v43 = vmax.f32 %v533_v27, %v534_v35 }
  0xf0   : > { %v554_v39 = vmax.f32 %v552_v23, %v553_v30 }
  0xf2   : > { %380 = vmax.xlane.f32.xlu1 %v379_v34 }
  0xf6   : > { %384 = vmax.xlane.f32.xlu1 %v383_v37 }
  0xf8   : > { %502 = vrot.lane.b32.xlu0 %v1651_v38, %s1412_s23 }
  0xfa   : > { %388 = vmax.xlane.f32.xlu1 %v387_v40 }
  0xfc   : > { %506 = vrot.lane.b32.xlu0 %v1651_v38, %s1414_s6 }
  0xfe   : > { %392 = vmax.xlane.f32.xlu1 %v391_v42 }
 0x100   : > { %510 = vrot.lane.b32.xlu0 %v1651_v38, %s1413_s4 }
 0x102   : > { %396 = vmax.xlane.f32.xlu1 %v395_v46 }
 0x106   : > { %400 = vmax.xlane.f32.xlu1 %v399_v50  ;;  %v536_v50 = vrot.slane %v535_v43, 1 }
 0x108   : > { %v537_v55 = vmax.f32 %v535_v43, %v536_v50 }
 0x10a   : > { %404 = vmax.xlane.f32.xlu1 %v403_v54 }
 0x10e   : > { %412 = vmax.xlane.f32.xlu1 %v411_v44 }
 0x112   : > { %291 = vmax.xlane.f32.xlu1 %v290_v60  ;;  %v559_v60 = vsel %vm2101_vm7, %v537_v55, %v544_v56  ;;  %vm429_vm7 = vcmask 80896  }
 0x113   : > { %v560_v4 = vsel %vm2103_vm8, %v559_v60, %v551_v57  ;;  %vm433_vm8 = vcmask 97280  }
 0x116   : > { %295 = vmax.xlane.f32.xlu1 %v294_v3 }
 0x11a   : > { %299 = vmax.xlane.f32.xlu1 %v298_v0 }
 0x11e   : > { %250 = vmax.xlane.f32.xlu1 %v249_v8 }
 0x122   : > { %482 = vmax.xlane.f32.xlu1 %v481_v9 }
 0x167   : > { %v353_v10 = vpop.xlane.xlu1 %352  ;;  %v1685_v11 = vpop.xlane.xlu0 %376 }
 0x16b   : > { %v357_v12 = vpop.xlane.xlu1 %356  ;;  %v1687_v13 = vpop.xlane.xlu0 %408 }
 0x16f   : > { %v361_v14 = vpop.xlane.xlu1 %360  ;;  %v1689_v2 = vpop.xlane.xlu0 %287 }
 0x173   : > { %v365_v17 = vpop.xlane.xlu1 %364  ;;  %v503_v18 = vpop.permute.xlu0 %502 }
 0x174   : > { %v505_v29 = vmax.f32 %v1651_v38, %v503_v18  ;;  %v555_v38 = vrot.slane %v554_v39, 2 }
 0x176   : > { %v556_v52 = vmax.f32 %v554_v39, %v555_v38 }
 0x177   : > { %v369_v24 = vpop.xlane.xlu1 %368  ;;  %v507_v26 = vpop.permute.xlu0 %506 }
 0x178   : > { %v509_v31 = vmax.f32 %v505_v29, %v507_v26  ;;  %v557_v25 = vrot.slane %v556_v52, 1  ;;  %v1751_v29 = vld [vmem:[%s1553_s11 + $0x10] sm:$0xff] }
 0x179   : > { %v634_v35 = vsel %vm2111_vm0, %v1751_v29, -inf  ;;  %vm2123_vm0 = vcmask 44064  }
 0x17a   : > { %v558_v63 = vmax.f32 %v556_v52, %v557_v25  ;;  %v635_v39 = vrot.slane %v634_v35, 4 }
 0x17b   : > { %v373_v33 = vpop.xlane.xlu1 %372  ;;  %v511_v34 = vpop.permute.xlu0 %510 }
 0x17c   : > { %v513_v37 = vmax.f32 %v509_v31, %v511_v34  ;;  %v561_v0 = vsel %vm2105_vm9, %v560_v4, %v558_v63  ;;  %vm2115_vm9 = vcmask 113664   ;;  %v636_v1 = vmax.f32 %v634_v35, %v635_v39 }
 0x17e   : > { %v517_v40 = vsel %vm2092_vm13, %v513_v37, -inf  ;;  %v514_v41 = vsel %vm2112_vm14, %v513_v37, -inf  ;;  %v520_v46 = vsel %vm2095_vm10, %v513_v37, -inf  ;;  %v523_v47 = vsel %vm2096_vm15, %v513_v37, -inf }
 0x17f   : > { %v381_v42 = vpop.xlane.xlu1 %380  ;;  %518 = vmax.xlane.f32.xlu1 %v517_v40  ;;  %515 = vmax.xlane.f32.xlu0 %v514_v41  ;;  %vm301_vm13 = vcmask 7168   ;;  %vm2102_vm10 = vcmask 31744   ;;  %vm419_vm15 = vcmask 39936   ;;  %v637_v45 = vrot.slane %v636_v1, 2 }
 0x180   : > { %v414_v44 = vsel %vm301_vm13, %v353_v10, %v357_v12 }
 0x181   : > { %v415_v58 = vsel %vm303_vm6, %v414_v44, %v361_v14 }
 0x182   : > { %v416_v61 = vsel %vm305_vm5, %v415_v58, %v365_v17 }
 0x183   : > { %v385_v49 = vpop.xlane.xlu1 %384  ;;  %521 = vmax.xlane.f32.xlu1 %v520_v46  ;;  %524 = vmax.xlane.f32.xlu0 %v523_v47  ;;  %v418_v62 = vsel %vm2102_vm10, %v416_v61, %v369_v24  ;;  %vm431_vm10 = vcmask 89088   ;;  %v638_v46 = vmax.f32 %v636_v1, %v637_v45 }
 0x184   : > { %v420_v3 = vsel %vm419_vm15, %v418_v62, %v373_v33 }
 0x185   : > { %v422_v6 = vsel %vm2104_vm2, %v420_v3, %v1685_v11  ;;  %vm435_vm2 = vcmask 105472   ;;  %v639_v48 = vrot.slane %v638_v46, 1 }
 0x186   : > { %v424_v7 = vsel %vm423_vm4, %v422_v6, %v381_v42 }
 0x187   : > { %v389_v54 = vpop.xlane.xlu1 %388  ;;  %v426_v8 = vsel %vm2106_vm3, %v424_v7, %v385_v49  ;;  %vm2110_vm3 = vcmask 121856   ;;  %v1767_v50 = vmax.f32 %v638_v46, %v639_v48 }
 0x188   : > { %v428_v10 = vsel %vm2107_vm12, %v426_v8, %v389_v54  ;;  %vm2108_vm12 = vcmask 125952  }
 0x18b   : > { %v393_v59 = vpop.xlane.xlu1 %392 }
 0x18c   : > { %v430_v12 = vsel %vm429_vm7, %v428_v10, %v393_v59 }
 0x18f   : > { %v397_v5 = vpop.xlane.xlu1 %396 }
 0x190   : > { %v432_v11 = vsel %vm431_vm10, %v430_v12, %v397_v5 }
 0x193   : > { %v401_v9 = vpop.xlane.xlu1 %400 }
 0x194   : > { %563 = vrot.lane.b32.xlu1 %v561_v0, %s1412_s23  ;;  %v434_v14 = vsel %vm433_vm8, %v432_v11, %v401_v9 }
 0x197   : > { %v405_v15 = vpop.xlane.xlu1 %404 }
 0x198   : > { %v436_v16 = vsel %vm435_vm2, %v434_v14, %v405_v15 }
 0x199   : > { %v438_v18 = vsel %vm2115_vm9, %v436_v16, %v1687_v13  ;;  %vm2136_vm9 = vcmask 523268  }
 0x19a   : > { %v682_v59 = vsel %vm2136_vm9, %v1751_v29, -inf  ;;  %vm2137_vm9 = vcmask 1040384  }
 0x19b   : > { %v413_v17 = vpop.xlane.xlu1 %412  ;;  %v683_v61 = vrot.slane %v682_v59, 4 }
 0x19c   : > { %v440_v19 = vsel %vm2110_vm3, %v438_v18, %v413_v17  ;;  %vm2122_vm3 = vcmask 27664  }
 0x19d   : > { %442 = vst.msk [vmem:[%s1726_s22] sm:$0xf] %vm2108_vm12, %v440_v19  ;;  %vm2109_vm12 = vcmask 0   ;;  %v684_v63 = vmax.f32 %v682_v59, %v683_v61 }
 0x19f   : > { %v292_v20 = vpop.xlane.xlu1 %291  ;;  %v685_v4 = vrot.slane %v684_v63, 2 }
 0x1a0   : > { %v302_v22 = vsel %vm301_vm13, %v1689_v2, %v292_v20 }
 0x1a1   : > { %v686_v6 = vmax.f32 %v684_v63, %v685_v4 }
 0x1a3   : > { %v296_v21 = vpop.xlane.xlu1 %295  ;;  %v687_v7 = vrot.slane %v686_v6, 1 }
 0x1a4   : > { %v304_v23 = vsel %vm303_vm6, %v302_v22, %v296_v21 }
 0x1a5   : > { %v688_v9 = vmax.f32 %v686_v6, %v687_v7 }
 0x1a7   : > { %v300_v13 = vpop.xlane.xlu1 %299 }
 0x1a8   : > { %v306_v24 = vsel %vm305_vm5, %v304_v23, %v300_v13 }
 0x1a9   : > { %307 = vst.msk [vmem:[%s1737_s29] sm:$0x3] %vm2112_vm14, %v306_v24 }
 0x1ab   : > { %v251_v2 = vpop.xlane.xlu1 %250 }
 0x1ac   : > { %253 = vst.msk [vmem:[%s1744_s10] sm:$0x1] %vm2109_vm12, %v251_v2 }
 0x1af   : > { %v483_v26 = vpop.xlane.xlu1 %482 }
 0x1b0   : > { %1193 = vst.msk [vmem:[%s1744_s10 + $0x1] sm:$0x1] %vm2109_vm12, %v483_v26  ;;  %vm2121_vm12 = vcmask 437664  }
 0x20c   : > { %v519_v27 = vpop.xlane.xlu1 %518  ;;  %v516_v28 = vpop.xlane.xlu0 %515 }
 0x20d   : > { %v526_v30 = vsel %vm301_vm13, %v516_v28, %v519_v27 }
 0x210   : > { %v522_v31 = vpop.xlane.xlu1 %521  ;;  %v525_v32 = vpop.xlane.xlu0 %524 }
 0x211   : > { %v527_v33 = vsel %vm303_vm6, %v526_v30, %v522_v31 }
 0x212   : > { %v528_v34 = vsel %vm305_vm5, %v527_v33, %v525_v32 }
 0x213   : > { %1194 = vst.msk [vmem:[%s1737_s29 + $0x2] sm:$0x3] %vm2112_vm14, %v528_v34  ;;  %vm2124_vm14 = vcmask 60464  }
 0x214   : > { %v564_v36 = vpop.permute.xlu1 %563 }
 0x215   : > { %v566_v37 = vmax.f32 %v561_v0, %v564_v36 }
 0x217   : > { %v579_v40 = vsel %vm2113_vm1, %v566_v37, -inf  ;;  %v567_v41 = vsel %vm2114_vm11, %v566_v37, -inf  ;;  %v609_v42 = vsel %vm2121_vm12, %v566_v37, -inf  ;;  %v570_v43 = vsel %vm2122_vm3, %v566_v37, -inf }
 0x218   : > { %580 = vmax.xlane.f32.xlu1 %v579_v40  ;;  %568 = vmax.xlane.f32.xlu0 %v567_v41  ;;  %v573_v38 = vsel %vm2123_vm0, %v566_v37, -inf  ;;  %v576_v47 = vsel %vm2124_vm14, %v566_v37, -inf  ;;  %vm2125_vm1 = vcmask 158864   ;;  %vm2126_vm11 = vcmask 175264  }
 0x219   : > { %v582_v49 = vsel %vm2125_vm1, %v566_v37, -inf  ;;  %v585_v51 = vsel %vm2126_vm11, %v566_v37, -inf  ;;  %vm2127_vm3 = vcmask 191664   ;;  %vm2128_vm0 = vcmask 273664  }
 0x21a   : > { %v588_v52 = vsel %vm2127_vm3, %v566_v37, -inf  ;;  %v591_v53 = vsel %vm2128_vm0, %v566_v37, -inf  ;;  %vm2129_vm1 = vcmask 290064   ;;  %vm2130_vm11 = vcmask 306464  }
 0x21b   : > { %v594_v54 = vsel %vm2129_vm1, %v566_v37, -inf  ;;  %v597_v55 = vsel %vm2130_vm11, %v566_v37, -inf  ;;  %vm2131_vm12 = vcmask 322864   ;;  %vm2132_vm14 = vcmask 404864  }
 0x21c   : > { %610 = vmax.xlane.f32.xlu1 %v609_v42  ;;  %571 = vmax.xlane.f32.xlu0 %v570_v43  ;;  %v600_v56 = vsel %vm2131_vm12, %v566_v37, -inf  ;;  %v603_v25 = vsel %vm2132_vm14, %v566_v37, -inf  ;;  %vm2133_vm3 = vcmask 421264   ;;  %vm2134_vm0 = vcmask 454064  }
 0x21d   : > { %v606_v44 = vsel %vm2133_vm3, %v566_v37, -inf  ;;  %v612_v57 = vsel %vm2134_vm0, %v566_v37, -inf  ;;  %vm2135_vm1 = vcmask 519168   ;;  %vm2138_vm11 = vcmask 31744  }
 0x21e   : > { %v675_v58 = vsel %vm2135_vm1, %v1751_v29, -inf  ;;  %vm2139_vm12 = vcmask 48128   ;;  %vm2140_vm14 = vcmask 64512   ;;  %vm2141_vm3 = vcmask 72704  }
 0x21f   : > { %v676_v60 = vrot.slane %v675_v58, 4  ;;  %vm2142_vm0 = vcmask 113664   ;;  %vm2143_vm1 = vcmask 121856  }
 0x220   : > { %574 = vmax.xlane.f32.xlu0 %v573_v38 }
 0x221   : > { %v677_v62 = vmax.f32 %v675_v58, %v676_v60 }
 0x223   : > { %v678_v3 = vrot.slane %v677_v62, 2 }
 0x224   : > { %577 = vmax.xlane.f32.xlu0 %v576_v47 }
 0x225   : > { %v679_v5 = vmax.f32 %v677_v62, %v678_v3 }
 0x227   : > { %v680_v0 = vrot.slane %v679_v5, 1 }
 0x228   : > { %583 = vmax.xlane.f32.xlu0 %v582_v49 }
 0x229   : > { %v681_v8 = vmax.f32 %v679_v5, %v680_v0 }
 0x22b   : > { %v1797_v10 = vsel %vm2137_vm9, %v681_v8, %v688_v9  ;;  %vm2144_vm9 = vcmask 125952  }
 0x22c   : > { %586 = vmax.xlane.f32.xlu0 %v585_v51 }
 0x22d   : > { %642 = vrot.lane.b32.xlu1 %v1767_v50, %s1412_s23 }
 0x230   : > { %589 = vmax.xlane.f32.xlu0 %v588_v52 }
 0x231   : > { %650 = vrot.lane.b32.xlu1 %v1767_v50, %s1413_s4 }
 0x234   : > { %592 = vmax.xlane.f32.xlu0 %v591_v53 }
 0x235   : > { %654 = vrot.lane.b32.xlu1 %v1767_v50, %s1415_s7 }
 0x238   : > { %595 = vmax.xlane.f32.xlu0 %v594_v54 }
 0x239   : > { %662 = vrot.lane.b32.xlu1 %v1767_v50, %s1417_s17 }
 0x23c   : > { %598 = vmax.xlane.f32.xlu0 %v597_v55 }
 0x240   : > { %601 = vmax.xlane.f32.xlu0 %v600_v56 }
 0x244   : > { %604 = vmax.xlane.f32.xlu0 %v603_v25 }
 0x248   : > { %607 = vmax.xlane.f32.xlu0 %v606_v44 }
 0x24c   : > { %613 = vmax.xlane.f32.xlu0 %v612_v57 }
 0x262   : > { %646 = vrot.lane.b32.xlu0 %v1767_v50, %s1414_s6 }
 0x266   : > { %658 = vrot.lane.b32.xlu0 %v1767_v50, %s1416_s8 }
 0x26a   : > { %666 = vrot.lane.b32.xlu0 %v1767_v50, %s1418_s19 }
 0x26e   : > { %691 = vrot.lane.b32.xlu0 %v1797_v10, %s1412_s23 }
 0x272   : > { %695 = vrot.lane.b32.xlu0 %v1797_v10, %s1414_s6 }
 0x276   : > { %699 = vrot.lane.b32.xlu0 %v1797_v10, %s1413_s4 }
 0x2a5   : > { %v569_v12 = vpop.xlane.xlu0 %568  ;;  %v581_v21 = vpop.xlane.xlu1 %580 }
 0x2a9   : > { %v572_v11 = vpop.xlane.xlu0 %571  ;;  %v611_v2 = vpop.xlane.xlu1 %610 }
 0x2aa   : > { %v615_v22 = vsel %vm301_vm13, %v569_v12, %v572_v11 }
 0x2ad   : > { %v575_v14 = vpop.xlane.xlu0 %574  ;;  %v643_v34 = vpop.permute.xlu1 %642 }
 0x2ae   : > { %v616_v23 = vsel %vm303_vm6, %v615_v22, %v575_v14  ;;  %v645_v45 = vmax.f32 %v1767_v50, %v643_v34 }
 0x2b1   : > { %v578_v15 = vpop.xlane.xlu0 %577  ;;  %v651_v1 = vpop.permute.xlu1 %650 }
 0x2b2   : > { %v617_v24 = vsel %vm305_vm5, %v616_v23, %v578_v15 }
 0x2b3   : > { %v618_v26 = vsel %vm2138_vm11, %v617_v24, %v581_v21  ;;  %vm2145_vm11 = vcmask 517120  }
 0x2b4   : > { %v720_v25 = vsel %vm2145_vm11, %v1751_v29, -inf  ;;  %vm2152_vm11 = vcmask 288000  }
 0x2b5   : > { %v584_v16 = vpop.xlane.xlu0 %583  ;;  %v655_v47 = vpop.permute.xlu1 %654  ;;  %v721_v59 = vrot.slane %v720_v25, 4 }
 0x2b6   : > { %v619_v28 = vsel %vm419_vm15, %v618_v26, %v584_v16 }
 0x2b7   : > { %v722_v5 = vmax.f32 %v720_v25, %v721_v59 }
 0x2b9   : > { %v587_v17 = vpop.xlane.xlu0 %586  ;;  %v663_v53 = vpop.permute.xlu1 %662  ;;  %v723_v11 = vrot.slane %v722_v5, 2 }
 0x2ba   : > { %v620_v30 = vsel %vm2139_vm12, %v619_v28, %v587_v17  ;;  %vm2146_vm12 = vcmask 519170  }
 0x2bb   : > { %v727_v50 = vsel %vm2146_vm12, %v1751_v29, -inf  ;;  %vm2153_vm12 = vcmask 320800  }
 0x2bc   : > { %v728_v60 = vrot.slane %v727_v50, 4 }
 0x2bd   : > { %v590_v18 = vpop.xlane.xlu0 %589 }
 0x2be   : > { %v621_v31 = vsel %vm423_vm4, %v620_v30, %v590_v18  ;;  %v729_v6 = vmax.f32 %v727_v50, %v728_v60 }
 0x2c0   : > { %v730_v14 = vrot.slane %v729_v6, 2 }
 0x2c1   : > { %v593_v19 = vpop.xlane.xlu0 %592 }
 0x2c2   : > { %v622_v32 = vsel %vm2140_vm14, %v621_v31, %v593_v19  ;;  %vm2147_vm14 = vcmask 57344   ;;  %v731_v19 = vmax.f32 %v729_v6, %v730_v14 }
 0x2c4   : > { %v732_v23 = vrot.slane %v731_v19, 1 }
 0x2c5   : > { %v596_v20 = vpop.xlane.xlu0 %595 }
 0x2c6   : > { %v623_v35 = vsel %vm2141_vm3, %v622_v32, %v596_v20  ;;  %vm2148_vm3 = vcmask 521220  }
 0x2c7   : > { %v734_v61 = vsel %vm2148_vm3, %v1751_v29, -inf  ;;  %vm2155_vm3 = vcmask 1041408  }
 0x2c8   : > { %v735_v63 = vrot.slane %v734_v61, 4 }
 0x2c9   : > { %v599_v13 = vpop.xlane.xlu0 %598 }
 0x2ca   : > { %v624_v36 = vsel %vm429_vm7, %v623_v35, %v599_v13  ;;  %v736_v9 = vmax.f32 %v734_v61, %v735_v63 }
 0x2cc   : > { %v737_v18 = vrot.slane %v736_v9, 2 }
 0x2cd   : > { %v602_v27 = vpop.xlane.xlu0 %601 }
 0x2ce   : > { %v625_v37 = vsel %vm431_vm10, %v624_v36, %v602_v27  ;;  %v738_v21 = vmax.f32 %v736_v9, %v737_v18  ;;  %v733_v27 = vmax.f32 %v731_v19, %v732_v23 }
 0x2d1   : > { %v605_v33 = vpop.xlane.xlu0 %604 }
 0x2d2   : > { %v626_v39 = vsel %vm433_vm8, %v625_v37, %v605_v33 }
 0x2d5   : > { %v608_v40 = vpop.xlane.xlu0 %607 }
 0x2d6   : > { %v627_v41 = vsel %vm435_vm2, %v626_v39, %v608_v40  ;;  %v1200_v39 = vld [vmem:[%s1553_s11 + $0x18] sm:$0xff]  ;;  %s1036_s11 = sshll.u32 %s1737_s29, 4  ;;  %s1974_s11 = int_to_ptr.vmem [resolvable:$true] %s1036_s11 }
 0x2d7   : > { %v628_v42 = vsel %vm2142_vm0, %v627_v41, %v611_v2  ;;  %vm2149_vm0 = vcmask 523270   ;;  %v739_v2 = vrot.slane %v738_v21, 1  ;;  %s1309_s20 = scalar_lea.vmem %s1974_s11, 128  ;;  %p1316_p10 = scmp.lt.s32.totalorder %s1974_s11, %s1314_s27 }
 0x2d8   : > { %v741_v3 = vsel %vm2149_vm0, %v1751_v29, -inf  ;;  %v724_v29 = vmax.f32 %v722_v5, %v723_v11  ;;  %vm2156_vm0 = vcmask 1042432   ;;  %p1310_p11 = scmp.ne.s32.totalorder %s1974_s11, %s1309_s20  ;;  %p1317_p0 = scmp.lt.s32.totalorder %s1315_s28, %s1309_s20 }
 0x2d9   : > { %v614_v43 = vpop.xlane.xlu0 %613  ;;  %v742_v7 = vrot.slane %v741_v3, 4  ;;  %v740_v30 = vmax.f32 %v738_v21, %v739_v2 }
 0x2da   : > { %v629_v38 = vsel %vm2143_vm1, %v628_v42, %v614_v43  ;;  %vm2150_vm1 = vcmask 58400   ;;  %v725_v22 = vrot.slane %v724_v29, 1  ;;  %p1311_p13 = pnand %p1310_p11, %p2217_p12  ;;  %p1318_p2 = por %p1317_p0, %p1316_p10 }
 0x2db   : > { %1195 = vst.msk [vmem:[%s1726_s22 + $0x4] sm:$0xf] %vm2144_vm9, %v629_v38  ;;  %vm2151_vm9 = vcmask 25600   ;;  %v743_v17 = vmax.f32 %v741_v3, %v742_v7 }
 0x2dc   : > { %v726_v26 = vmax.f32 %v724_v29, %v725_v22  ;;  %p1312_p8 = pneg %p1311_p13 }
 0x2dd   : > { %v647_v46 = vpop.permute.xlu0 %646  ;;  %v744_v20 = vrot.slane %v743_v17, 2 }
 0x2de   : > { %v649_v48 = vmax.f32 %v645_v45, %v647_v46  ;;  %p1319_p4 = pnand %p1318_p2, %p1312_p8 }
 0x2df   : > { %v745_v24 = vmax.f32 %v743_v17, %v744_v20 }
 0x2e0   : > { %v653_v49 = vmax.f32 %v649_v48, %v651_v1 }
 0x2e1   : > { %v659_v51 = vpop.permute.xlu0 %658  ;;  %v746_v28 = vrot.slane %v745_v24, 1 }
 0x2e2   : > { %v657_v52 = vmax.f32 %v653_v49, %v655_v47 }
 0x2e3   : > { %v747_v32 = vmax.f32 %v745_v24, %v746_v28 }
 0x2e4   : > { %v661_v54 = vmax.f32 %v657_v52, %v659_v51 }
 0x2e5   : > { %v667_v55 = vpop.permute.xlu0 %666 }
 0x2e6   : > { %v665_v56 = vmax.f32 %v661_v54, %v663_v53 }
 0x2e8   : > { %v669_v44 = vmax.f32 %v665_v56, %v667_v55 }
 0x2e9   : > { %v692_v57 = vpop.permute.xlu0 %691 }
 0x2ea   : > { %v670_v58 = vsel %vm2147_vm14, %v669_v44, -inf  ;;  %v694_v4 = vmax.f32 %v1797_v10, %v692_v57  ;;  %vm2154_vm14 = vcmask 1040384  }
 0x2eb   : > { %671 = vmax.xlane.f32.xlu1 %v670_v58  ;;  %v748_v31 = vsel %vm2154_vm14, %v726_v26, %v733_v27  ;;  %vm2161_vm14 = vcmask 25600  }
 0x2ec   : > { %v749_v33 = vsel %vm2155_vm3, %v748_v31, %v740_v30  ;;  %vm2162_vm3 = vcmask 27664  }
 0x2ed   : > { %v696_v62 = vpop.permute.xlu0 %695  ;;  %v750_v34 = vsel %vm2156_vm0, %v749_v33, %v747_v32  ;;  %vm2163_vm0 = vcmask 517120  }
 0x2ee   : > { %v698_v0 = vmax.f32 %v694_v4, %v696_v62  ;;  %v909_v53 = vsel %vm2163_vm0, %v1200_v39, -inf  ;;  %vm2170_vm0 = vcmask 158864  }
 0x2ef   : > { %v910_v25 = vrot.slane %v909_v53, 4 }
 0x2f1   : > { %v700_v8 = vpop.permute.xlu0 %699  ;;  %v911_v61 = vmax.f32 %v909_v53, %v910_v25 }
 0x2f2   : > { %v702_v12 = vmax.f32 %v698_v0, %v700_v8 }
 0x2f3   : > { %v912_v6 = vrot.slane %v911_v61, 2 }
 0x2f4   : > { %v706_v15 = vsel %vm2150_vm1, %v702_v12, -inf  ;;  %v703_v16 = vsel %vm2151_vm9, %v702_v12, -inf  ;;  %v709_v10 = vsel %vm2152_vm11, %v702_v12, -inf  ;;  %v712_v13 = vsel %vm2153_vm12, %v702_v12, -inf }
 0x2f5   : > { %707 = vmax.xlane.f32.xlu1 %v706_v15  ;;  %704 = vmax.xlane.f32.xlu0 %v703_v16  ;;  %vm2157_vm1 = vcmask 0   ;;  %vm2158_vm9 = vcmask 523264   ;;  %vm2159_vm11 = vcmask 175264   ;;  %vm2160_vm12 = vcmask 11264  }
 0x2f6   : > { %v823_v40 = vsel %vm2158_vm9, %v1200_v39, -inf  ;;  %vm2165_vm9 = vcmask 44064   ;;  %v913_v11 = vmax.f32 %v911_v61, %v912_v6 }
 0x2f7   : > { %v824_v43 = vrot.slane %v823_v40, 4 }
 0x2f8   : > { %v914_v19 = vrot.slane %v913_v11, 1 }
 0x2f9   : > { %710 = vmax.xlane.f32.xlu1 %v709_v10  ;;  %v825_v51 = vmax.f32 %v823_v40, %v824_v43 }
 0x2fb   : > { %v826_v55 = vrot.slane %v825_v51, 2 }
 0x2fd   : > { %713 = vmax.xlane.f32.xlu1 %v712_v13  ;;  %v827_v57 = vmax.f32 %v825_v51, %v826_v55  ;;  %v915_v13 = vmax.f32 %v913_v11, %v914_v19 }
 0x2ff   : > { %v828_v63 = vrot.slane %v827_v57, 1 }
 0x301   : > { %v1868_v7 = vmax.f32 %v827_v57, %v828_v63 }
 0x30b   : > { %752 = vrot.lane.b32.xlu0 %v750_v34, %s1412_s23 }
 0x378   : > { %v672_v35 = vpop.xlane.xlu1 %671 }
 0x379   : > { %1197 = vst.msk [vmem:[%s1744_s10 + $0x2] sm:$0x1] %vm2157_vm1, %v672_v35  ;;  %vm2164_vm1 = vcmask 519170  }
 0x37a   : > { %v916_v54 = vsel %vm2164_vm1, %v1200_v39, -inf  ;;  %vm2171_vm1 = vcmask 191664  }
 0x37b   : > { %v917_v50 = vrot.slane %v916_v54, 4 }
 0x37d   : > { %v918_v62 = vmax.f32 %v916_v54, %v917_v50 }
 0x37f   : > { %v919_v0 = vrot.slane %v918_v62, 2 }
 0x381   : > { %v920_v14 = vmax.f32 %v918_v62, %v919_v0 }
 0x382   : > { %v708_v36 = vpop.xlane.xlu1 %707  ;;  %v705_v37 = vpop.xlane.xlu0 %704 }
 0x383   : > { %v715_v45 = vsel %vm301_vm13, %v705_v37, %v708_v36  ;;  %v921_v10 = vrot.slane %v920_v14, 1 }
 0x385   : > { %v922_v24 = vmax.f32 %v920_v14, %v921_v10 }
 0x386   : > { %v711_v41 = vpop.xlane.xlu1 %710  ;;  %v753_v1 = vpop.permute.xlu0 %752 }
 0x387   : > { %v1845_v42 = vmax.f32 %v750_v34, %v753_v1  ;;  %v716_v47 = vsel %vm303_vm6, %v715_v45, %v711_v41 }
 0x389   : > { %v774_v38 = vsel %vm2159_vm11, %v1845_v42, -inf  ;;  %v756_v46 = vsel %vm2160_vm12, %v1845_v42, -inf  ;;  %v759_v52 = vsel %vm2162_vm3, %v1845_v42, -inf  ;;  %v762_v56 = vsel %vm2165_vm9, %v1845_v42, -inf }
 0x38a   : > { %v714_v48 = vpop.xlane.xlu1 %713  ;;  %775 = vmax.xlane.f32.xlu0 %v774_v38  ;;  %757 = vmax.xlane.f32.xlu1 %v756_v46  ;;  %vm2166_vm11 = vcmask 521220   ;;  %vm2167_vm12 = vcmask 60464   ;;  %vm2169_vm3 = vcmask 142464   ;;  %v771_v9 = vsel %vm2170_vm0, %v1845_v42, -inf }
 0x38b   : > { %v717_v49 = vsel %vm305_vm5, %v716_v47, %v714_v48  ;;  %v923_v44 = vsel %vm2166_vm11, %v1200_v39, -inf  ;;  %v765_v58 = vsel %vm2167_vm12, %v1845_v42, -inf  ;;  %v768_v4 = vsel %vm2169_vm3, %v1845_v42, -inf }
 0x38c   : > { %1198 = vst.msk [vmem:[%s1737_s29 + $0x4] sm:$0x3] %vm2161_vm14, %v717_v49  ;;  %v924_v59 = vrot.slane %v923_v44, 4  ;;  %vm2168_vm14 = vcmask 523270   ;;  %v777_v16 = vsel %vm2171_vm1, %v1845_v42, -inf  ;;  %vm2172_vm9 = vcmask 519168  }
 0x38d   : > { %v930_v60 = vsel %vm2168_vm14, %v1200_v39, -inf  ;;  %v864_v18 = vsel %vm2172_vm9, %v1200_v39, -inf  ;;  %vm2173_vm11 = vcmask 523268   ;;  %vm2174_vm12 = vcmask 1040384  }
 0x38e   : > { %760 = vmax.xlane.f32.xlu1 %v759_v52  ;;  %v931_v3 = vrot.slane %v930_v60, 4  ;;  %v925_v5 = vmax.f32 %v923_v44, %v924_v59  ;;  %v871_v29 = vsel %vm2173_vm11, %v1200_v39, -inf  ;;  %v865_v21 = vrot.slane %v864_v18, 4  ;;  %vm2177_vm0 = vmmov %vm2174_vm12 }
 0x38f   : > { %v872_v22 = vrot.slane %v871_v29, 4  ;;  %v937_v30 = vsel %vm2174_vm12, %v915_v13, %v922_v24  ;;  %vm2175_vm14 = vcmask 1041408   ;;  %vm2176_vm3 = vcmask 1042432  }
 0x390   : > { %v932_v8 = vmax.f32 %v930_v60, %v931_v3  ;;  %v926_v12 = vrot.slane %v925_v5, 2  ;;  %v866_v26 = vmax.f32 %v864_v18, %v865_v21  ;;  %vm2178_vm1 = vcmask 290064  }
 0x391   : > { %v873_v27 = vmax.f32 %v871_v29, %v872_v22  ;;  %v783_v45 = vsel %vm2178_vm1, %v1845_v42, -inf  ;;  %vm2179_vm9 = vcmask 306464   ;;  %vm2180_vm11 = vcmask 322864  }
 0x392   : > { %763 = vmax.xlane.f32.xlu1 %v762_v56  ;;  %v933_v15 = vrot.slane %v932_v8, 2  ;;  %v927_v17 = vmax.f32 %v925_v5, %v926_v12  ;;  %v867_v32 = vrot.slane %v866_v26, 2  ;;  %v786_v38 = vsel %vm2179_vm9, %v1845_v42, -inf }
 0x393   : > { %v874_v33 = vrot.slane %v873_v27, 2  ;;  %v789_v46 = vsel %vm2180_vm11, %v1845_v42, -inf  ;;  %vm2181_vm12 = vcmask 421264   ;;  %vm2185_vm1 = vcmask 437664  }
 0x394   : > { %v934_v20 = vmax.f32 %v932_v8, %v933_v15  ;;  %v928_v23 = vrot.slane %v927_v17, 1  ;;  %v868_v36 = vmax.f32 %v866_v26, %v867_v32  ;;  %v795_v47 = vsel %vm2181_vm12, %v1845_v42, -inf }
 0x395   : > { %v875_v37 = vmax.f32 %v873_v27, %v874_v33  ;;  %v798_v52 = vsel %vm2185_vm1, %v1845_v42, -inf  ;;  %vm2186_vm9 = vcmask 31744   ;;  %vm2187_vm11 = vcmask 48128  }
 0x396   : > { %766 = vmax.xlane.f32.xlu1 %v765_v58  ;;  %v935_v2 = vrot.slane %v934_v20, 1  ;;  %v929_v28 = vmax.f32 %v927_v17, %v928_v23  ;;  %v869_v39 = vrot.slane %v868_v36, 1  ;;  %vm2188_vm12 = vcmask 27664  }
 0x397   : > { %v876_v40 = vrot.slane %v875_v37, 1  ;;  %vm2192_vm1 = vcmask 158864  }
 0x398   : > { %v936_v31 = vmax.f32 %v934_v20, %v935_v2  ;;  %v938_v34 = vsel %vm2175_vm14, %v937_v30, %v929_v28  ;;  %v870_v41 = vmax.f32 %v868_v36, %v869_v39  ;;  %vm2182_vm14 = vcmask 454064  }
 0x399   : > { %v877_v1 = vmax.f32 %v875_v37, %v876_v40  ;;  %v801_v48 = vsel %vm2182_vm14, %v1845_v42, -inf  ;;  %vm2189_vm14 = vcmask 11264  }
 0x39a   : > { %769 = vmax.xlane.f32.xlu1 %v768_v4  ;;  %v939_v35 = vsel %vm2176_vm3, %v938_v34, %v936_v31  ;;  %vm2183_vm3 = vcmask 273664  }
 0x39b   : > { %v1889_v43 = vsel %vm2177_vm0, %v870_v41, %v877_v1  ;;  %v780_v49 = vsel %vm2183_vm3, %v1845_v42, -inf  ;;  %vm2184_vm0 = vcmask 404864   ;;  %vm2190_vm3 = vcmask 60464  }
 0x39c   : > { %v792_v51 = vsel %vm2184_vm0, %v1845_v42, -inf  ;;  %vm2191_vm0 = vcmask 44064  }
 0x39e   : > { %772 = vmax.xlane.f32.xlu1 %v771_v9 }
 0x3a0   : > { %839 = vrot.lane.b32.xlu0 %v1868_v7, %s1413_s4 }
 0x3a2   : > { %778 = vmax.xlane.f32.xlu1 %v777_v16 }
 0x3a4   : > { %855 = vrot.lane.b32.xlu0 %v1868_v7, %s1418_s19  ;;  %s1015_s19 = scalar_lea.sflag [#allocation4], %s1549_s5 }
 0x3b3   : > { %941 = vrot.lane.b32.xlu1 %v939_v35, %s1412_s23 }
 0x3b7   : > { %831 = vrot.lane.b32.xlu1 %v1868_v7, %s1412_s23 }
 0x3bb   : > { %835 = vrot.lane.b32.xlu1 %v1868_v7, %s1414_s6 }
 0x3bf   : > { %880 = vrot.lane.b32.xlu1 %v1889_v43, %s1412_s23  ;;  %s1213_s23 = sshll.u32 %s1466_s16, 7 }
 0x3c3   : > { %784 = vmax.xlane.f32.xlu0 %v783_v45  ;;  %843 = vrot.lane.b32.xlu1 %v1868_v7, %s1415_s7 }
 0x3c7   : > { %787 = vmax.xlane.f32.xlu0 %v786_v38  ;;  %884 = vrot.lane.b32.xlu1 %v1889_v43, %s1414_s6 }
 0x3cb   : > { %790 = vmax.xlane.f32.xlu0 %v789_v46  ;;  %847 = vrot.lane.b32.xlu1 %v1868_v7, %s1416_s8  ;;  %s1981_s8 = scalar_lea.hbm %s2074_s2, %s1213_s23 }
 0x3cf   : > { %796 = vmax.xlane.f32.xlu0 %v795_v47  ;;  %888 = vrot.lane.b32.xlu1 %v1889_v43, %s1413_s4  ;;  %s1052_s4 = sshll.u32 %s1726_s22, 4  ;;  %s1984_s4 = int_to_ptr.vmem [resolvable:$true] %s1052_s4 }
 0x3d3   : > { %802 = vmax.xlane.f32.xlu0 %v801_v48  ;;  %851 = vrot.lane.b32.xlu1 %v1868_v7, %s1417_s17  ;;  %s1214_s17 = sshll.u32 %s1466_s16, 8 }
 0x3f7   : > { %781 = vmax.xlane.f32.xlu1 %v780_v49 }
 0x3fb   : > { %793 = vmax.xlane.f32.xlu1 %v792_v51 }
 0x3ff   : > { %799 = vmax.xlane.f32.xlu1 %v798_v52 }
 0x417   : > { %v758_v53 = vpop.xlane.xlu1 %757  ;;  %v776_v61 = vpop.xlane.xlu0 %775 }
 0x41b   : > { %v761_v54 = vpop.xlane.xlu1 %760  ;;  %v840_v2 = vpop.permute.xlu0 %839 }
 0x41c   : > { %v804_v55 = vsel %vm301_vm13, %v758_v53, %v761_v54 }
 0x41f   : > { %v764_v56 = vpop.xlane.xlu1 %763  ;;  %v856_v40 = vpop.permute.xlu0 %855 }
 0x420   : > { %v805_v25 = vsel %vm303_vm6, %v804_v55, %v764_v56 }
 0x423   : > { %v767_v50 = vpop.xlane.xlu1 %766 }
 0x424   : > { %v806_v44 = vsel %vm305_vm5, %v805_v25, %v767_v50 }
 0x427   : > { %v770_v57 = vpop.xlane.xlu1 %769 }
 0x428   : > { %v807_v58 = vsel %vm2186_vm9, %v806_v44, %v770_v57  ;;  %vm2193_vm9 = vcmask 142464  }
 0x42b   : > { %v773_v59 = vpop.xlane.xlu1 %772 }
 0x42c   : > { %v808_v60 = vsel %vm419_vm15, %v807_v58, %v773_v59 }
 0x42d   : > { %v809_v42 = vsel %vm2187_vm11, %v808_v60, %v776_v61  ;;  %vm2194_vm11 = vcmask 191664  }
 0x42f   : > { %v779_v62 = vpop.xlane.xlu1 %778 }
 0x430   : > { %v1926_v63 = vsel %vm423_vm4, %v809_v42, %v779_v62 }
 0x433   : > { %v942_v3 = vpop.permute.xlu1 %941 }
 0x434   : > { %v944_v4 = vmax.f32 %v939_v35, %v942_v3 }
 0x436   : > { %v948_v5 = vsel %vm2188_vm12, %v944_v4, -inf  ;;  %v945_v6 = vsel %vm2189_vm14, %v944_v4, -inf  ;;  %v954_v8 = vsel %vm2190_vm3, %v944_v4, -inf  ;;  %v951_v9 = vsel %vm2191_vm0, %v944_v4, -inf }
 0x437   : > { %949 = vmax.xlane.f32.xlu0 %v948_v5  ;;  %946 = vmax.xlane.f32.xlu1 %v945_v6  ;;  %v832_v0 = vpop.permute.xlu1 %831  ;;  %v960_v11 = vsel %vm2192_vm1, %v944_v4, -inf  ;;  %v957_v14 = vsel %vm2193_vm9, %v944_v4, -inf  ;;  %v966_v16 = vsel %vm2194_vm11, %v944_v4, -inf  ;;  %vm2195_vm12 = vcmask 175264  }
 0x438   : > { %v963_v17 = vsel %vm2195_vm12, %v944_v4, -inf  ;;  %vm2196_vm14 = vcmask 290064   ;;  %vm2197_vm3 = vcmask 273664   ;;  %v834_v20 = vmax.f32 %v1868_v7, %v832_v0 }
 0x439   : > { %v972_v29 = vsel %vm2196_vm14, %v944_v4, -inf  ;;  %v969_v19 = vsel %vm2197_vm3, %v944_v4, -inf  ;;  %vm2198_vm0 = vcmask 322864   ;;  %vm2199_vm1 = vcmask 306464  }
 0x43a   : > { %v978_v21 = vsel %vm2198_vm0, %v944_v4, -inf  ;;  %v975_v22 = vsel %vm2199_vm1, %v944_v4, -inf  ;;  %vm2200_vm9 = vcmask 404864   ;;  %vm2201_vm11 = vcmask 58400  }
 0x43b   : > { %955 = vmax.xlane.f32.xlu0 %v954_v8  ;;  %952 = vmax.xlane.f32.xlu1 %v951_v9  ;;  %v836_v12 = vpop.permute.xlu1 %835  ;;  %v981_v27 = vsel %vm2200_vm9, %v944_v4, -inf  ;;  %vm2202_vm12 = vcmask 25600   ;;  %vm2203_vm14 = vcmask 288000   ;;  %vm2204_vm3 = vcmask 421264  }
 0x43c   : > { %v838_v13 = vmax.f32 %v834_v20, %v836_v12  ;;  %v984_v39 = vsel %vm2204_vm3, %v944_v4, -inf  ;;  %vm2205_vm0 = vcmask 320800   ;;  %vm2206_vm1 = vcmask 437664  }
 0x43d   : > { %vm2207_vm9 = vcmask 454064   ;;  %vm2211_vm3 = vcmask 113664  }
 0x43e   : > { %v842_v30 = vmax.f32 %v838_v13, %v840_v2  ;;  %v990_v45 = vsel %vm2207_vm9, %v944_v4, -inf  ;;  %vm2214_vm9 = vcmask 31744  }
 0x43f   : > { %961 = vmax.xlane.f32.xlu0 %v960_v11  ;;  %958 = vmax.xlane.f32.xlu1 %v957_v14  ;;  %v881_v15 = vpop.permute.xlu1 %880 }
 0x440   : > { %v883_v24 = vmax.f32 %v1889_v43, %v881_v15  ;;  %v987_v43 = vsel %vm2206_vm1, %v944_v4, -inf  ;;  %vm2213_vm1 = vcmask 125952  }
 0x443   : > { %967 = vmax.xlane.f32.xlu0 %v966_v16  ;;  %964 = vmax.xlane.f32.xlu1 %v963_v17  ;;  %v844_v18 = vpop.permute.xlu1 %843 }
 0x444   : > { %v846_v32 = vmax.f32 %v842_v30, %v844_v18 }
 0x447   : > { %973 = vmax.xlane.f32.xlu0 %v972_v29  ;;  %970 = vmax.xlane.f32.xlu1 %v969_v19  ;;  %v885_v10 = vpop.permute.xlu1 %884 }
 0x448   : > { %v887_v26 = vmax.f32 %v883_v24, %v885_v10 }
 0x44b   : > { %979 = vmax.xlane.f32.xlu0 %v978_v21  ;;  %976 = vmax.xlane.f32.xlu1 %v975_v22  ;;  %v848_v23 = vpop.permute.xlu1 %847 }
 0x44c   : > { %v850_v35 = vmax.f32 %v846_v32, %v848_v23 }
 0x44f   : > { %982 = vmax.xlane.f32.xlu1 %v981_v27  ;;  %v889_v28 = vpop.permute.xlu1 %888 }
 0x450   : > { %v891_v31 = vmax.f32 %v887_v26, %v889_v28  ;;  %v785_v46 = vpop.xlane.xlu0 %784 }
 0x452   : > { %v895_v7 = vsel %vm2201_vm11, %v891_v31, -inf  ;;  %v892_v33 = vsel %vm2202_vm12, %v891_v31, -inf  ;;  %v898_v37 = vsel %vm2203_vm14, %v891_v31, -inf  ;;  %v901_v1 = vsel %vm2205_vm0, %v891_v31, -inf }
 0x453   : > { %896 = vmax.xlane.f32.xlu1 %v895_v7  ;;  %893 = vmax.xlane.f32.xlu0 %v892_v33  ;;  %v852_v34 = vpop.permute.xlu1 %851  ;;  %vm2208_vm11 = vcmask 57344   ;;  %vm2209_vm12 = vcmask 64512   ;;  %vm2210_vm14 = vcmask 72704   ;;  %vm2212_vm0 = vcmask 121856  }
 0x454   : > { %v854_v36 = vmax.f32 %v850_v35, %v852_v34  ;;  %v788_v47 = vpop.xlane.xlu0 %787 }
 0x456   : > { %v858_v41 = vmax.f32 %v854_v36, %v856_v40 }
 0x457   : > { %899 = vmax.xlane.f32.xlu1 %v898_v37  ;;  %985 = vmax.xlane.f32.xlu0 %v984_v39 }
 0x458   : > { %v859_v38 = vsel %vm2208_vm11, %v858_v41, -inf  ;;  %v791_v48 = vpop.xlane.xlu0 %790  ;;  %vm2215_vm11 = vcmask 48128  }
 0x45b   : > { %902 = vmax.xlane.f32.xlu1 %v901_v1  ;;  %988 = vmax.xlane.f32.xlu0 %v987_v43 }
 0x45c   : > { %v797_v53 = vpop.xlane.xlu0 %796 }
 0x45f   : > { %991 = vmax.xlane.f32.xlu0 %v990_v45  ;;  %860 = vmax.xlane.f32.xlu1 %v859_v38 }
 0x460   : > { %v803_v57 = vpop.xlane.xlu0 %802 }
 0x484   : > { %v782_v49 = vpop.xlane.xlu1 %781 }
 0x485   : > { %v811_v51 = vsel %vm2209_vm12, %v1926_v63, %v782_v49 }
 0x486   : > { %v812_v52 = vsel %vm2210_vm14, %v811_v51, %v785_v46 }
 0x487   : > { %v813_v54 = vsel %vm429_vm7, %v812_v52, %v788_v47 }
 0x488   : > { %v814_v55 = vsel %vm431_vm10, %v813_v54, %v791_v48  ;;  %v794_v56 = vpop.xlane.xlu1 %793 }
 0x489   : > { %v815_v25 = vsel %vm433_vm8, %v814_v55, %v794_v56 }
 0x48a   : > { %v816_v50 = vsel %vm435_vm2, %v815_v25, %v797_v53 }
 0x48c   : > { %v800_v44 = vpop.xlane.xlu1 %799 }
 0x48d   : > { %v817_v58 = vsel %vm2211_vm3, %v816_v50, %v800_v44 }
 0x48e   : > { %v818_v59 = vsel %vm2212_vm0, %v817_v58, %v803_v57 }
 0x48f   : > { %1199 = vst.msk [vmem:[%s1726_s22 + $0x8] sm:$0xf] %vm2213_vm1, %v818_v59 }
 0x4c4   : > { %v950_v60 = vpop.xlane.xlu0 %949  ;;  %v947_v61 = vpop.xlane.xlu1 %946 }
 0x4c5   : > { %v993_v0 = vsel %vm301_vm13, %v947_v61, %v950_v60 }
 0x4c8   : > { %v956_v42 = vpop.xlane.xlu0 %955  ;;  %v953_v62 = vpop.xlane.xlu1 %952 }
 0x4c9   : > { %v994_v8 = vsel %vm303_vm6, %v993_v0, %v953_v62 }
 0x4ca   : > { %v995_v11 = vsel %vm305_vm5, %v994_v8, %v956_v42 }
 0x4cc   : > { %v962_v63 = vpop.xlane.xlu0 %961  ;;  %v959_v3 = vpop.xlane.xlu1 %958 }
 0x4cd   : > { %v996_v14 = vsel %vm2214_vm9, %v995_v11, %v959_v3 }
 0x4ce   : > { %v997_v17 = vsel %vm419_vm15, %v996_v14, %v962_v63 }
 0x4d0   : > { %v968_v4 = vpop.xlane.xlu0 %967  ;;  %v965_v5 = vpop.xlane.xlu1 %964 }
 0x4d1   : > { %v998_v18 = vsel %vm2215_vm11, %v997_v17, %v965_v5 }
 0x4d2   : > { %v999_v10 = vsel %vm423_vm4, %v998_v18, %v968_v4  ;;  %vm2216_vm4 = vcmask 25600  }
 0x4d4   : > { %v971_v6 = vpop.xlane.xlu1 %970  ;;  %v974_v9 = vpop.xlane.xlu0 %973 }
 0x4d5   : > { %v1000_v20 = vsel %vm2209_vm12, %v999_v10, %v971_v6 }
 0x4d6   : > { %v1001_v23 = vsel %vm2210_vm14, %v1000_v20, %v974_v9 }
 0x4d8   : > { %v977_v12 = vpop.xlane.xlu1 %976  ;;  %v980_v15 = vpop.xlane.xlu0 %979 }
 0x4d9   : > { %v1002_v13 = vsel %vm429_vm7, %v1001_v23, %v977_v12 }
 0x4da   : > { %v1003_v28 = vsel %vm431_vm10, %v1002_v13, %v980_v15 }
 0x4dc   : > { %v983_v16 = vpop.xlane.xlu1 %982 }
 0x4dd   : > { %v1004_v31 = vsel %vm433_vm8, %v1003_v28, %v983_v16 }
 0x4e0   : > { %v894_v29 = vpop.xlane.xlu0 %893  ;;  %v897_v19 = vpop.xlane.xlu1 %896 }
 0x4e1   : > { %v904_v24 = vsel %vm301_vm13, %v894_v29, %v897_v19 }
 0x4e4   : > { %v986_v21 = vpop.xlane.xlu0 %985  ;;  %v900_v22 = vpop.xlane.xlu1 %899 }
 0x4e5   : > { %v905_v2 = vsel %vm303_vm6, %v904_v24, %v900_v22  ;;  %v1005_v32 = vsel %vm435_vm2, %v1004_v31, %v986_v21 }
 0x4e8   : > { %v989_v26 = vpop.xlane.xlu0 %988  ;;  %v903_v27 = vpop.xlane.xlu1 %902 }
 0x4e9   : > { %v906_v30 = vsel %vm305_vm5, %v905_v2, %v903_v27 }
 0x4ea   : > { %1202 = vst.msk [vmem:[%s1737_s29 + $0x6] sm:$0x3] %vm2216_vm4, %v906_v30 }
 0x4eb   : > { %1322 = shalt.err (!%p1319_p4)
}
 0x4ec   : > { %s1323_s29 = scalar_lea.hbm %s1981_s8, 128  ;;  %s1327_s23 = scalar_lea.hbm %s2074_s2, 256 }
 0x4ed   : > { %p1324_p5 = scmp.ne.s32.totalorder %s1981_s8, %s1323_s29  ;;  %p1328_p1 = scmp.lt.u32.totalorder %s1981_s8, %s2074_s2 }
 0x4ee   : > { %p1329_p3 = scmp.lt.u32.totalorder %s1327_s23, %s1323_s29  ;;  %p1331_p11 = scmp.lt.u32.totalorder %s1323_s29, %s1981_s8 }
 0x4ef   : > { %p1325_p7 = pnand %p1324_p5, %p2217_p12 }
 0x4f0   : > { %p1330_p6 = por %p1329_p3, %p1328_p1 }
 0x4f1   : > { %p1326_p9 = pneg %p1325_p7 }
 0x4f2   : > { %p1332_p13 = por %p1331_p11, %p1330_p6 }
 0x4f4   : > { %p1333_p8 = pnand %p1332_p13, %p1326_p9 }
 0x4f6   : > { %1336 = shalt.err (!%p1333_p8)
}
 0x4f7   : > { %s1420_s20 = smov 32   ;;  %s1421_s26 = smov 2   ;;  %vm2218_vm2 = vmmov %vm2211_vm3  ;;  %v992_v33 = vpop.xlane.xlu0 %991  ;;  %v861_v34 = vpop.xlane.xlu1 %860  ;;  %vm2220_vm6 = vcmask 0  }
 0x4f8   : > { %1217 = dma.vmem_to_hbm [thread:$0]  (%p2217_p12), %s1974_s11, 128, %s1981_s8, %s1015_s19, %s1420_s20, %s1420_s20, %s1421_s26   ;;  %v1006_v7 = vsel %vm2218_vm2, %v1005_v32, %v989_v26  ;;  %vm2219_vm5 = vmmov %vm2212_vm0 }
 0x4f9   : > { %s2023_s29 = scalar_lea.hbm %s2075_s3, %s1214_s17  ;;  %v1007_v35 = vsel %vm2219_vm5, %v1006_v7, %v992_v33  ;;  %1201 = vst.msk [vmem:[%s1744_s10 + $0x3] sm:$0x1] %vm2220_vm6, %v861_v34  ;;  %vm2221_vm7 = vmmov %vm2213_vm1  ;;  %s1020_s30 = scalar_lea.sflag [#allocation7], %s1549_s5 }
 0x4fa   : > { %1203 = vst.msk [vmem:[%s1726_s22 + $0xc] sm:$0xf] %vm2221_vm7, %v1007_v35  ;;  %s1337_s9 = scalar_lea.vmem %s1984_s4, 256  ;;  %s1422_s11 = smov [#allocation6]  }
 0x4fb   : > { %p1338_p10 = scmp.ne.s32.totalorder %s1984_s4, %s1337_s9  ;;  %s1341_s8 = sshll.u32 %s1422_s11, 4  ;;  %s1342_s8 = int_to_ptr.vmem [resolvable:$false] %s1341_s8 }
 0x4fc   : > { %s1343_s16 = scalar_lea.vmem %s1342_s8, 512  ;;  %p1344_p4 = scmp.lt.s32.totalorder %s1984_s4, %s1342_s8 }
 0x4fd   : > { %p1339_p0 = pnand %p1338_p10, %p2217_p12  ;;  %p1345_p5 = scmp.lt.s32.totalorder %s1343_s16, %s1337_s9 }
 0x4ff   : > { %p1340_p2 = pneg %p1339_p0  ;;  %p1346_p7 = por %p1345_p5, %p1344_p4 }
 0x501   : > { %p1347_p9 = pnand %p1346_p7, %p1340_p2 }
 0x503   : > { %1350 = shalt.err (!%p1347_p9)
}
 0x504   : > { %s1351_s22 = scalar_lea.hbm %s2023_s29, 256  ;;  %s1355_s19 = scalar_lea.hbm %s2075_s3, 512 }
 0x505   : > { %p1352_p1 = scmp.ne.s32.totalorder %s2023_s29, %s1351_s22  ;;  %p1356_p11 = scmp.lt.u32.totalorder %s2023_s29, %s2075_s3 }
 0x506   : > { %p1357_p13 = scmp.lt.u32.totalorder %s1355_s19, %s1351_s22  ;;  %p1359_p10 = scmp.lt.u32.totalorder %s1351_s22, %s2023_s29 }
 0x507   : > { %p1353_p3 = pnand %p1352_p1, %p2217_p12 }
 0x508   : > { %p1358_p8 = por %p1357_p13, %p1356_p11 }
 0x509   : > { %p1354_p6 = pneg %p1353_p3 }
 0x50a   : > { %p1360_p0 = por %p1359_p10, %p1358_p8 }
 0x50c   : > { %p1361_p2 = pnand %p1360_p0, %p1354_p6 }
 0x50e   : > { %1364 = shalt.err (!%p1361_p2)
}
 0x50f   : > { %s1423_s7 = smov 64   ;;  %s1424_s20 = smov 4  }
 0x510   : > { %1218 = dma.vmem_to_hbm [thread:$0]  (%p2217_p12), %s1984_s4, 256, %s2023_s29, %s1020_s30, %s1423_s7, %s1423_s7, %s1424_s20  }
 0x511 PF: > { %s1074_s26 = sand.u32 1, %s1395_s12   ;;  %p2222_p4 = scmp.ne.s32.totalorder %s2119_s25, 0 }
 0x512   : > { %p2223_p5 = scmp.ge.s32.totalorder %s1407_s15, 2  ;;  %s1075_s27 = scalar_lea.sflag [#allocation4], %s1074_s26 }
 0x514   : > { %p1226_p7 = pnand %p2223_p5, %p2222_p4 }
 0x516   : > { %1386 = dma.done.wait (!%p1226_p7), %s1075_s27, 128  }
 0x517   : > { %1388 = vsyncadd (!%p1226_p7), %s1075_s27, 4294967168  ;;  %s1084_s28 = scalar_lea.sflag [#allocation7], %s1074_s26 }
 0x518   : > { %1390 = dma.done.wait (!%p1226_p7), %s1084_s28, 256  }
 0x519   : > { %1392 = vsyncadd (!%p1226_p7), %s1084_s28, 4294967040  ;;  %p20_p12 = scmp.ge.s32.totalorder %s1470_s18, 4   ;;  %s2224_s12 = smov %s1399_s13 }
 0x51a   : > { %s2225_s13 = smov %s1403_s14  ;;  %s2226_s14 = smov %s1482_s21 }
 0x51b   : > { %s2227_s15 = smov %s1470_s18  ;;  %22 = sbr.rel (!%p20_p12) target bundleno = 7 (0x7), region = 110 }
 0x522   :  { %1089 = vsyncpa [#allocation3], 1 }
 0x523   :  { %1091 = vsyncpa [#allocation3 + $0x1], 1 }
 0x524   :  { %1092 = vsyncpa [#allocation4], 1 }
 0x525   :  { %1094 = vsyncpa [#allocation4 + $0x1], 1 }
 0x526   :  { %1095 = vsyncpa [#allocation7], 1 }
 0x527   :  { %1097 = vsyncpa [#allocation7 + $0x1], 1 }

</bundles_post_ra>
